<compile_context>
chip_gen: v7x
topology: tpu7x:2x2x1
jax: 0.10.0
libtpu: 0.0.40
codegen_flags: <defaults>
</compile_context>

<pallas_src>
import functools

import jax
import jax.numpy as jnp
from jax.experimental import pallas as pl
from jax.experimental.pallas import tpu as pltpu

_LANE = 128
_SUBLANE = 8


def _round_up(n, m):
    return (n + m - 1) // m * m


def _pad2d(a, rows, cols):
    """Zero-pad a 2D array up to (rows, cols)."""
    return jnp.pad(a, ((0, rows - a.shape[0]), (0, cols - a.shape[1])))


# ---------------------------------------------------------------------------
# Fused LINKX kernel.  Grid = (row tiles, K tiles over num_nodes).
# ---------------------------------------------------------------------------
def _linkx_kernel(adj_ref, feat_ref,
                  wa_ref, ba_ref,
                  wx_ref, bx_ref,
                  wwa_ref, wwx_ref, bw_ref,
                  wh_ref, bh_ref, sc_ref, sh_ref,
                  wl_ref, bl_ref,
                  out_ref, xa_acc,
                  *, num_hidden, compute_dtype):
    f32 = jnp.float32
    k = pl.program_id(1)

    @pl.when(k == 0)
    def _():
        xa_acc[...] = jnp.zeros_like(xa_acc)

    # Streamed adjacency matmul: int8 {0,1} tile -> bf16 (exact) -> MXU, f32 acc.
    adj_tile = adj_ref[...].astype(compute_dtype)
    xa_acc[...] += jnp.dot(adj_tile, wa_ref[...], preferred_element_type=f32)

    @pl.when(k == pl.num_programs(1) - 1)
    def _():
        # --- mlpa / mlpx (single Linear each; init_layers == 1 -> no ReLU/BN) ---
        xa = xa_acc[...] + ba_ref[...]
        xx = jnp.dot(feat_ref[...], wx_ref[...],
                     preferred_element_type=f32) + bx_ref[...]

        # --- w([xa, xx]) as a split matmul (no in-kernel concat); cast once ---
        xa_c = xa.astype(compute_dtype)
        xx_c = xx.astype(compute_dtype)
        h = (jnp.dot(xa_c, wwa_ref[...], preferred_element_type=f32)
             + jnp.dot(xx_c, wwx_ref[...], preferred_element_type=f32)
             + bw_ref[...])
        # inner_dropout / inner_activation are False (module defaults) -> skipped.
        h = jnp.maximum(h + xa + xx, 0.0)

        # --- mlp_final hidden layers: Linear -> ReLU -> folded eval BatchNorm ---
        for l in range(num_hidden):
            z = jnp.dot(h.astype(compute_dtype), wh_ref[l],
                        preferred_element_type=f32)
            z = jnp.maximum(z + bh_ref[l], 0.0)
            h = z * sc_ref[l] + sh_ref[l]       # dropout: identity in eval mode

        # --- final Linear, lane-dense bf16 store ---
        out = jnp.dot(h.astype(compute_dtype), wl_ref[...],
                      preferred_element_type=f32) + bl_ref[...]
        out_ref[...] = out.astype(out_ref.dtype)


# ---------------------------------------------------------------------------
# Host-side wrapper: fold BN, pad to lane-dense shapes, launch one pallas_call.
# ---------------------------------------------------------------------------
def linkx_forward(params, adj, feats, *, eps=1e-5, tm=256, tk=1024,
                  compute_dtype=jnp.bfloat16, out_dtype=jnp.bfloat16):
    N, num_nodes = adj.shape
    _, in_c = feats.shape
    (Wa, ba), = params["mlpa"]
    (Wx, bx), = params["mlpx"]
    Ww, bw = params["w"]
    lins = params["final_lins"]
    bns = params["final_bns"]
    hidden = Wa.shape[0]
    out_c = lins[-1][0].shape[0]
    num_hidden = len(lins) - 1
    assert num_hidden >= 1, "mlp_final needs num_layers >= 2 in this kernel"

    f32 = jnp.float32

    # Padded feature sizes (lane-dense: multiples of 128 on every feature axis).
    Hp = _round_up(hidden, _LANE)
    INp = _round_up(in_c, _LANE)
    OUTp = _round_up(out_c, _LANE)

    # Contraction (num_nodes) tiling: adjacency + Wa stream K-tile by K-tile,
    # bounding VMEM to a constant regardless of graph size.
    tk = max(_LANE, min(_round_up(tk, _LANE), _round_up(num_nodes, _LANE)))
    Ap = _round_up(num_nodes, tk)
    k_tiles = Ap // tk

    # Row tiling: keep >= 2 row tiles (megacore) and pad N up to a multiple of tm.
    tm = max(_SUBLANE, min(tm, _round_up(pl.cdiv(N, 2), _SUBLANE)))
    n_tiles = pl.cdiv(N, tm)
    N_pad = n_tiles * tm

    # -- inputs: adjacency as int8 in HBM (values are exactly {0,1}), feats bf16 --
    # TODO(synk): if the real graph carries non-binary edge weights, keep adj bf16.
    adj_p = _pad2d(adj.astype(jnp.int8), N_pad, Ap)
    feat_p = _pad2d(feats.astype(f32), N_pad, INp).astype(compute_dtype)

    # -- mlpa / mlpx weights (PyTorch (out, in) -> (in, out), zero-padded) --
    wa = _pad2d(Wa.T.astype(f32), Ap, Hp).astype(compute_dtype)
    ba_p = _pad2d(ba.reshape(1, -1).astype(f32), 1, Hp)
    wx = _pad2d(Wx.T.astype(f32), INp, Hp).astype(compute_dtype)
    bx_p = _pad2d(bx.reshape(1, -1).astype(f32), 1, Hp)

    # -- w: Linear(2*hidden, hidden) split into the xa / xx halves --
    WwT = Ww.T.astype(f32)                               # (2*hidden, hidden)
    wwa = _pad2d(WwT[:hidden], Hp, Hp).astype(compute_dtype)
    wwx = _pad2d(WwT[hidden:], Hp, Hp).astype(compute_dtype)
    bw_p = _pad2d(bw.reshape(1, -1).astype(f32), 1, Hp)

    # -- mlp_final hidden layers: stacked weights + folded eval-mode BN affine --
    wh, bh, sc, sh = [], [], [], []
    for (W, b), (gamma, beta, rmean, rvar) in zip(lins[:-1], bns):
        scale = gamma / jnp.sqrt(rvar + eps)
        shift = beta - rmean * scale
        wh.append(_pad2d(W.T.astype(f32), Hp, Hp).astype(compute_dtype))
        bh.append(_pad2d(b.reshape(1, -1).astype(f32), 1, Hp))
        sc.append(_pad2d(scale.reshape(1, -1).astype(f32), 1, Hp))
        sh.append(_pad2d(shift.reshape(1, -1).astype(f32), 1, Hp))
    wh = jnp.stack(wh)          # (L-1, Hp, Hp)
    bh = jnp.stack(bh)          # (L-1, 1, Hp)
    sc = jnp.stack(sc)
    sh = jnp.stack(sh)

    # -- final Linear --
    Wl, bl = lins[-1]
    wl = _pad2d(Wl.T.astype(f32), Hp, OUTp).astype(compute_dtype)
    bl_p = _pad2d(bl.reshape(1, -1).astype(f32), 1, OUTp)

    # Constant-index-map weights: single-buffered (their block index never changes).
    def _const(shape):
        nd = len(shape)

        def idx(i, k):
            return (0,) * nd

        if hasattr(pl, "Buffered"):
            return pl.BlockSpec(shape, idx, pipeline_mode=pl.Buffered(1))
        return pl.BlockSpec(shape, idx)

    kernel = functools.partial(_linkx_kernel, num_hidden=num_hidden,
                               compute_dtype=compute_dtype)

    # Scheduler hint: MXU flops + HBM traffic (the adjacency stream dominates).
    flops = 2 * N_pad * Hp * (Ap + INp + 2 * Hp + num_hidden * Hp + OUTp)
    bytes_accessed = (adj_p.size * adj_p.dtype.itemsize
                      + feat_p.size * feat_p.dtype.itemsize
                      + (wa.size + wx.size + wwa.size + wwx.size
                         + wh.size + wl.size) * 2
                      + N_pad * OUTp * jnp.dtype(out_dtype).itemsize)
    cost = pl.CostEstimate(flops=int(flops), transcendentals=0,
                           bytes_accessed=int(bytes_accessed))

    out_p = pl.pallas_call(
        kernel,
        out_shape=jax.ShapeDtypeStruct((N_pad, OUTp), out_dtype),
        grid=(n_tiles, k_tiles),
        in_specs=[
            pl.BlockSpec((tm, tk), lambda i, k: (i, k)),    # adjacency row x K tile
            pl.BlockSpec((tm, INp), lambda i, k: (i, 0)),   # node-feature row tile
            pl.BlockSpec((tk, Hp), lambda i, k: (k, 0)),    # Wa K tile (streamed)
            _const(ba_p.shape),                              # mlpa bias
            _const(wx.shape), _const(bx_p.shape),            # mlpx
            _const(wwa.shape), _const(wwx.shape), _const(bw_p.shape),  # w
            _const(wh.shape), _const(bh.shape),              # final hidden layers
            _const(sc.shape), _const(sh.shape),
            _const(wl.shape), _const(bl_p.shape),            # final linear
        ],
        out_specs=pl.BlockSpec((tm, OUTp), lambda i, k: (i, 0)),
        scratch_shapes=[pltpu.VMEM((tm, Hp), jnp.float32)],  # xa accumulator
        compiler_params=pltpu.CompilerParams(
            dimension_semantics=("parallel", "arbitrary"),
            vmem_limit_bytes=48 * 1024 * 1024),
        cost_estimate=cost,
    )(adj_p, feat_p, wa, ba_p, wx, bx_p, wwa, wwx, bw_p,
      wh, bh, sc, sh, wl, bl_p)

    return out_p[:N, :out_c]


# ---------------------------------------------------------------------------
# Pure-JAX reference (mirrors the bf16-operand / f32-accumulate math).
# ---------------------------------------------------------------------------
def linkx_reference(params, adj, feats, *, eps=1e-5, compute_dtype=jnp.bfloat16):
    f32 = jnp.float32

    def mm(a, w_t):
        return jnp.dot(a.astype(compute_dtype), w_t.astype(compute_dtype),
                       preferred_element_type=f32)

    (Wa, ba), = params["mlpa"]
    (Wx, bx), = params["mlpx"]
    Ww, bw = params["w"]
    xa = mm(adj, Wa.T) + ba
    xx = mm(feats, Wx.T) + bx
    x = mm(jnp.concatenate([xa, xx], axis=-1), Ww.T) + bw
    x = jnp.maximum(x + xa + xx, 0.0)
    lins, bns = params["final_lins"], params["final_bns"]
    for (W, b), (gamma, beta, rmean, rvar) in zip(lins[:-1], bns):
        scale = gamma / jnp.sqrt(rvar + eps)
        shift = beta - rmean * scale
        z = jnp.maximum(mm(x, W.T) + b, 0.0)
        x = z * scale + shift
    Wl, bl = lins[-1]
    return mm(x, Wl.T) + bl


# ---------------------------------------------------------------------------
# Deterministic synthetic parameters (PyTorch shapes: W is (out, in)).
# ---------------------------------------------------------------------------
def _init_linear(key, fan_in, fan_out):
    kw, kb = jax.random.split(key)
    bound = 1.0 / (fan_in ** 0.5)
    W = jax.random.uniform(kw, (fan_out, fan_in), jnp.float32, -bound, bound)
    b = jax.random.uniform(kb, (fan_out,), jnp.float32, -bound, bound)
    return W, b


def init_linkx_params(key, in_channels, hidden_channels, out_channels,
                      num_layers, num_nodes):
    keys = iter(jax.random.split(key, 4 + 4 * num_layers))
    params = {
        "mlpa": [_init_linear(next(keys), num_nodes, hidden_channels)],
        "mlpx": [_init_linear(next(keys), in_channels, hidden_channels)],
        "w": _init_linear(next(keys), 2 * hidden_channels, hidden_channels),
    }
    dims = [hidden_channels] * num_layers + [out_channels]
    lins = [_init_linear(next(keys), dims[li], dims[li + 1])
            for li in range(num_layers)]
    bns = []
    for _ in range(num_layers - 1):
        kg, kb, km, kv = jax.random.split(next(keys), 4)
        c = hidden_channels
        gamma = 1.0 + 0.1 * jax.random.normal(kg, (c,), jnp.float32)
        beta = 0.1 * jax.random.normal(kb, (c,), jnp.float32)
        rmean = 0.1 * jax.random.normal(km, (c,), jnp.float32)
        rvar = jnp.abs(1.0 + 0.1 * jax.random.normal(kv, (c,), jnp.float32))
        bns.append((gamma, beta, rmean, rvar))
    params["final_lins"] = lins
    params["final_bns"] = bns
    return params


if __name__ == "__main__":
    # Small LINKX: 256 nodes (256x256 adjacency), 32-dim features, hidden 64,
    # 16 classes, 3-layer final MLP.  tm=128 -> 2 "parallel" row tiles
    # (megacore-friendly), tk=128 -> 2 "arbitrary" K tiles so the streamed
    # adjacency-accumulation path is exercised.
    N_NODES, IN_C, HID_C, OUT_C, NUM_LAYERS = 256, 32, 64, 16, 3

    key = jax.random.PRNGKey(0)
    key, kfeat, kedge = jax.random.split(key, 3)
    feats = jax.random.normal(kfeat, (N_NODES, IN_C), jnp.float32)
    # Dense {0,1} adjacency standing in for the SparseTensor COO matrix.
    adj = (jax.random.uniform(kedge, (N_NODES, N_NODES), jnp.float32) < 0.05
           ).astype(jnp.float32)

    params = init_linkx_params(key, IN_C, HID_C, OUT_C, NUM_LAYERS, N_NODES)

    out = linkx_forward(params, adj, feats, tm=128, tk=128)
    out = jax.block_until_ready(out)

    ref = linkx_reference(params, adj, feats)
    assert out.shape == (N_NODES, OUT_C)
    out_f32 = out.astype(jnp.float32)
    max_err = float(jnp.max(jnp.abs(out_f32 - ref)))
    assert jnp.allclose(out_f32, ref, atol=2e-2, rtol=2e-2), \
        f"mismatch vs reference (max abs err {max_err})"

    print("KERNEL_OK")
</pallas_src>

<mosaic_0001>
module attributes {stable_mosaic.version = 11 : i64} {
  func.func @_linkx_kernel(%arg0: i32, %arg1: i32, %arg2: memref<128x128xi8, #tpu.memory_space<vmem>>, %arg3: memref<128x128xbf16, #tpu.memory_space<vmem>>, %arg4: memref<128x128xbf16, #tpu.memory_space<vmem>>, %arg5: memref<1x128xf32, #tpu.memory_space<vmem>>, %arg6: memref<128x128xbf16, #tpu.memory_space<vmem>>, %arg7: memref<1x128xf32, #tpu.memory_space<vmem>>, %arg8: memref<128x128xbf16, #tpu.memory_space<vmem>>, %arg9: memref<128x128xbf16, #tpu.memory_space<vmem>>, %arg10: memref<1x128xf32, #tpu.memory_space<vmem>>, %arg11: memref<2x128x128xbf16, #tpu.memory_space<vmem>>, %arg12: memref<2x1x128xf32, #tpu.memory_space<vmem>>, %arg13: memref<2x1x128xf32, #tpu.memory_space<vmem>>, %arg14: memref<2x1x128xf32, #tpu.memory_space<vmem>>, %arg15: memref<128x128xbf16, #tpu.memory_space<vmem>>, %arg16: memref<1x128xf32, #tpu.memory_space<vmem>>, %arg17: memref<128x128xbf16, #tpu.memory_space<vmem>>, %arg18: memref<128x128xf32, #tpu.memory_space<vmem>>) attributes {dimension_semantics = [#tpu.dimension_semantics<parallel>, #tpu.dimension_semantics<arbitrary>], iteration_bounds = array<i64: 2, 2>, scalar_prefetch = 0 : i64, scratch_operands = 1 : i64, tpu.core_type = #tpu.core_type<tc>, window_params = [{transform_indices = @transform_0, window_bounds = array<i64: 128, 128>}, {transform_indices = @transform_1, window_bounds = array<i64: 128, 128>}, {transform_indices = @transform_2, window_bounds = array<i64: 128, 128>}, {pipeline_mode = #tpu.pipeline_mode<synchronous>, transform_indices = @transform_3, window_bounds = array<i64: 1, 128>}, {pipeline_mode = #tpu.pipeline_mode<synchronous>, transform_indices = @transform_4, window_bounds = array<i64: 128, 128>}, {pipeline_mode = #tpu.pipeline_mode<synchronous>, transform_indices = @transform_5, window_bounds = array<i64: 1, 128>}, {pipeline_mode = #tpu.pipeline_mode<synchronous>, transform_indices = @transform_6, window_bounds = array<i64: 128, 128>}, {pipeline_mode = #tpu.pipeline_mode<synchronous>, transform_indices = @transform_7, window_bounds = array<i64: 128, 128>}, {pipeline_mode = #tpu.pipeline_mode<synchronous>, transform_indices = @transform_8, window_bounds = array<i64: 1, 128>}, {pipeline_mode = #tpu.pipeline_mode<synchronous>, transform_indices = @transform_9, window_bounds = array<i64: 2, 128, 128>}, {pipeline_mode = #tpu.pipeline_mode<synchronous>, transform_indices = @transform_10, window_bounds = array<i64: 2, 1, 128>}, {pipeline_mode = #tpu.pipeline_mode<synchronous>, transform_indices = @transform_11, window_bounds = array<i64: 2, 1, 128>}, {pipeline_mode = #tpu.pipeline_mode<synchronous>, transform_indices = @transform_12, window_bounds = array<i64: 2, 1, 128>}, {pipeline_mode = #tpu.pipeline_mode<synchronous>, transform_indices = @transform_13, window_bounds = array<i64: 128, 128>}, {pipeline_mode = #tpu.pipeline_mode<synchronous>, transform_indices = @transform_14, window_bounds = array<i64: 1, 128>}, {transform_indices = @transform_15, window_bounds = array<i64: 128, 128>}]} {
    %c0_i32 = arith.constant 0 : i32
    %0 = arith.cmpi eq, %arg1, %c0_i32 : i32
    %1 = arith.extui %0 : i1 to i32
    %c0_i32_0 = arith.constant 0 : i32
    %2 = arith.cmpi ne, %1, %c0_i32_0 : i32
    scf.if %2 {
      %cst_9 = arith.constant 0.000000e+00 : f32
      %13 = vector.broadcast %cst_9 : f32 to vector<128x128xf32>
      %c0_10 = arith.constant 0 : index
      %c0_11 = arith.constant 0 : index
      %14 = vector.load %arg18[%c0_10, %c0_11] : memref<128x128xf32, #tpu.memory_space<vmem>>, vector<128x128xf32>
      tpu.vector_store %arg18[%c0_10, %c0_11], %13 {strides = array<i32>} : memref<128x128xf32, #tpu.memory_space<vmem>>, vector<128x128xf32>,
    } else {
    }
    %c0 = arith.constant 0 : index
    %c0_1 = arith.constant 0 : index
    %3 = vector.load %arg2[%c0, %c0_1] : memref<128x128xi8, #tpu.memory_space<vmem>>, vector<128x128xi8>
    %4 = arith.sitofp %3 : vector<128x128xi8> to vector<128x128xbf16>
    %c0_2 = arith.constant 0 : index
    %c0_3 = arith.constant 0 : index
    %5 = vector.load %arg18[%c0_2, %c0_3] : memref<128x128xf32, #tpu.memory_space<vmem>>, vector<128x128xf32>
    %c0_4 = arith.constant 0 : index
    %c0_5 = arith.constant 0 : index
    %6 = vector.load %arg4[%c0_4, %c0_5] : memref<128x128xbf16, #tpu.memory_space<vmem>>, vector<128x128xbf16>
    %cst = arith.constant dense<0.000000e+00> : vector<128x128xf32>
    %7 = tpu.matmul %4, %6, %cst {dimension_numbers = #tpu.dot_dimension_numbers<[1], [0], [0], [1], [0, 0, 1, 1], [], []>} : vector<128x128xbf16>, vector<128x128xbf16>, vector<128x128xf32> -> vector<128x128xf32>
    %8 = arith.addf %5, %7 : vector<128x128xf32>
    %c0_6 = arith.constant 0 : index
    %c0_7 = arith.constant 0 : index
    %9 = vector.load %arg18[%c0_6, %c0_7] : memref<128x128xf32, #tpu.memory_space<vmem>>, vector<128x128xf32>
    tpu.vector_store %arg18[%c0_6, %c0_7], %8 {strides = array<i32>} : memref<128x128xf32, #tpu.memory_space<vmem>>, vector<128x128xf32>,
    %c1_i32 = arith.constant 1 : i32
    %10 = arith.cmpi eq, %arg1, %c1_i32 : i32
    %11 = arith.extui %10 : i1 to i32
    %c0_i32_8 = arith.constant 0 : i32
    %12 = arith.cmpi ne, %11, %c0_i32_8 : i32
    scf.if %12 {
      %c0_9 = arith.constant 0 : index
      %c0_10 = arith.constant 0 : index
      %13 = vector.load %arg18[%c0_9, %c0_10] : memref<128x128xf32, #tpu.memory_space<vmem>>, vector<128x128xf32>
      %c0_11 = arith.constant 0 : index
      %c0_12 = arith.constant 0 : index
      %14 = vector.load %arg5[%c0_11, %c0_12] : memref<1x128xf32, #tpu.memory_space<vmem>>, vector<1x128xf32>
      %15 = vector.broadcast %14 : vector<1x128xf32> to vector<128x128xf32>
      %16 = arith.addf %13, %15 : vector<128x128xf32>
      %c0_13 = arith.constant 0 : index
      %c0_14 = arith.constant 0 : index
      %17 = vector.load %arg3[%c0_13, %c0_14] : memref<128x128xbf16, #tpu.memory_space<vmem>>, vector<128x128xbf16>
      %c0_15 = arith.constant 0 : index
      %c0_16 = arith.constant 0 : index
      %18 = vector.load %arg6[%c0_15, %c0_16] : memref<128x128xbf16, #tpu.memory_space<vmem>>, vector<128x128xbf16>
      %cst_17 = arith.constant dense<0.000000e+00> : vector<128x128xf32>
      %19 = tpu.matmul %17, %18, %cst_17 {dimension_numbers = #tpu.dot_dimension_numbers<[1], [0], [0], [1], [0, 0, 1, 1], [], []>} : vector<128x128xbf16>, vector<128x128xbf16>, vector<128x128xf32> -> vector<128x128xf32>
      %c0_18 = arith.constant 0 : index
      %c0_19 = arith.constant 0 : index
      %20 = vector.load %arg7[%c0_18, %c0_19] : memref<1x128xf32, #tpu.memory_space<vmem>>, vector<1x128xf32>
      %21 = vector.broadcast %20 : vector<1x128xf32> to vector<128x128xf32>
      %22 = arith.addf %19, %21 : vector<128x128xf32>
      %23 = arith.truncf %16 : vector<128x128xf32> to vector<128x128xbf16>
      %24 = arith.truncf %22 : vector<128x128xf32> to vector<128x128xbf16>
      %c0_20 = arith.constant 0 : index
      %c0_21 = arith.constant 0 : index
      %25 = vector.load %arg8[%c0_20, %c0_21] : memref<128x128xbf16, #tpu.memory_space<vmem>>, vector<128x128xbf16>
      %cst_22 = arith.constant dense<0.000000e+00> : vector<128x128xf32>
      %26 = tpu.matmul %23, %25, %cst_22 {dimension_numbers = #tpu.dot_dimension_numbers<[1], [0], [0], [1], [0, 0, 1, 1], [], []>} : vector<128x128xbf16>, vector<128x128xbf16>, vector<128x128xf32> -> vector<128x128xf32>
      %c0_23 = arith.constant 0 : index
      %c0_24 = arith.constant 0 : index
      %27 = vector.load %arg9[%c0_23, %c0_24] : memref<128x128xbf16, #tpu.memory_space<vmem>>, vector<128x128xbf16>
      %cst_25 = arith.constant dense<0.000000e+00> : vector<128x128xf32>
      %28 = tpu.matmul %24, %27, %cst_25 {dimension_numbers = #tpu.dot_dimension_numbers<[1], [0], [0], [1], [0, 0, 1, 1], [], []>} : vector<128x128xbf16>, vector<128x128xbf16>, vector<128x128xf32> -> vector<128x128xf32>
      %29 = arith.addf %26, %28 : vector<128x128xf32>
      %c0_26 = arith.constant 0 : index
      %c0_27 = arith.constant 0 : index
      %30 = vector.load %arg10[%c0_26, %c0_27] : memref<1x128xf32, #tpu.memory_space<vmem>>, vector<1x128xf32>
      %31 = vector.broadcast %30 : vector<1x128xf32> to vector<128x128xf32>
      %32 = arith.addf %29, %31 : vector<128x128xf32>
      %33 = arith.addf %32, %16 : vector<128x128xf32>
      %34 = arith.addf %33, %22 : vector<128x128xf32>
      %cst_28 = arith.constant 0.000000e+00 : f32
      %35 = vector.broadcast %cst_28 : f32 to vector<128x128xf32>
      %36 = arith.maximumf %34, %35 : vector<128x128xf32>
      %37 = arith.truncf %36 : vector<128x128xf32> to vector<128x128xbf16>
      %c0_29 = arith.constant 0 : index
      %c0_30 = arith.constant 0 : index
      %c0_31 = arith.constant 0 : index
      %38 = vector.load %arg11[%c0_29, %c0_30, %c0_31] : memref<2x128x128xbf16, #tpu.memory_space<vmem>>, vector<1x128x128xbf16>
      %39 = vector.shape_cast %38 : vector<1x128x128xbf16> to vector<128x128xbf16>
      %cst_32 = arith.constant dense<0.000000e+00> : vector<128x128xf32>
      %40 = tpu.matmul %37, %39, %cst_32 {dimension_numbers = #tpu.dot_dimension_numbers<[1], [0], [0], [1], [0, 0, 1, 1], [], []>} : vector<128x128xbf16>, vector<128x128xbf16>, vector<128x128xf32> -> vector<128x128xf32>
      %c0_33 = arith.constant 0 : index
      %c0_34 = arith.constant 0 : index
      %c0_35 = arith.constant 0 : index
      %41 = vector.load %arg12[%c0_33, %c0_34, %c0_35] : memref<2x1x128xf32, #tpu.memory_space<vmem>>, vector<1x1x128xf32>
      %42 = vector.shape_cast %41 : vector<1x1x128xf32> to vector<1x128xf32>
      %43 = vector.broadcast %42 : vector<1x128xf32> to vector<128x128xf32>
      %44 = arith.addf %40, %43 : vector<128x128xf32>
      %cst_36 = arith.constant 0.000000e+00 : f32
      %45 = vector.broadcast %cst_36 : f32 to vector<128x128xf32>
      %46 = arith.maximumf %44, %45 : vector<128x128xf32>
      %c0_37 = arith.constant 0 : index
      %c0_38 = arith.constant 0 : index
      %c0_39 = arith.constant 0 : index
      %47 = vector.load %arg13[%c0_37, %c0_38, %c0_39] : memref<2x1x128xf32, #tpu.memory_space<vmem>>, vector<1x1x128xf32>
      %48 = vector.shape_cast %47 : vector<1x1x128xf32> to vector<1x128xf32>
      %49 = vector.broadcast %48 : vector<1x128xf32> to vector<128x128xf32>
      %50 = arith.mulf %46, %49 : vector<128x128xf32>
      %c0_40 = arith.constant 0 : index
      %c0_41 = arith.constant 0 : index
      %c0_42 = arith.constant 0 : index
      %51 = vector.load %arg14[%c0_40, %c0_41, %c0_42] : memref<2x1x128xf32, #tpu.memory_space<vmem>>, vector<1x1x128xf32>
      %52 = vector.shape_cast %51 : vector<1x1x128xf32> to vector<1x128xf32>
      %53 = vector.broadcast %52 : vector<1x128xf32> to vector<128x128xf32>
      %54 = arith.addf %50, %53 : vector<128x128xf32>
      %55 = arith.truncf %54 : vector<128x128xf32> to vector<128x128xbf16>
      %c1 = arith.constant 1 : index
      %c0_43 = arith.constant 0 : index
      %c0_44 = arith.constant 0 : index
      %56 = vector.load %arg11[%c1, %c0_43, %c0_44] : memref<2x128x128xbf16, #tpu.memory_space<vmem>>, vector<1x128x128xbf16>
      %57 = vector.shape_cast %56 : vector<1x128x128xbf16> to vector<128x128xbf16>
      %cst_45 = arith.constant dense<0.000000e+00> : vector<128x128xf32>
      %58 = tpu.matmul %55, %57, %cst_45 {dimension_numbers = #tpu.dot_dimension_numbers<[1], [0], [0], [1], [0, 0, 1, 1], [], []>} : vector<128x128xbf16>, vector<128x128xbf16>, vector<128x128xf32> -> vector<128x128xf32>
      %c1_46 = arith.constant 1 : index
      %c0_47 = arith.constant 0 : index
      %c0_48 = arith.constant 0 : index
      %59 = vector.load %arg12[%c1_46, %c0_47, %c0_48] : memref<2x1x128xf32, #tpu.memory_space<vmem>>, vector<1x1x128xf32>
      %60 = vector.shape_cast %59 : vector<1x1x128xf32> to vector<1x128xf32>
      %61 = vector.broadcast %60 : vector<1x128xf32> to vector<128x128xf32>
      %62 = arith.addf %58, %61 : vector<128x128xf32>
      %cst_49 = arith.constant 0.000000e+00 : f32
      %63 = vector.broadcast %cst_49 : f32 to vector<128x128xf32>
      %64 = arith.maximumf %62, %63 : vector<128x128xf32>
      %c1_50 = arith.constant 1 : index
      %c0_51 = arith.constant 0 : index
      %c0_52 = arith.constant 0 : index
      %65 = vector.load %arg13[%c1_50, %c0_51, %c0_52] : memref<2x1x128xf32, #tpu.memory_space<vmem>>, vector<1x1x128xf32>
      %66 = vector.shape_cast %65 : vector<1x1x128xf32> to vector<1x128xf32>
      %67 = vector.broadcast %66 : vector<1x128xf32> to vector<128x128xf32>
      %68 = arith.mulf %64, %67 : vector<128x128xf32>
      %c1_53 = arith.constant 1 : index
      %c0_54 = arith.constant 0 : index
      %c0_55 = arith.constant 0 : index
      %69 = vector.load %arg14[%c1_53, %c0_54, %c0_55] : memref<2x1x128xf32, #tpu.memory_space<vmem>>, vector<1x1x128xf32>
      %70 = vector.shape_cast %69 : vector<1x1x128xf32> to vector<1x128xf32>
      %71 = vector.broadcast %70 : vector<1x128xf32> to vector<128x128xf32>
      %72 = arith.addf %68, %71 : vector<128x128xf32>
      %73 = arith.truncf %72 : vector<128x128xf32> to vector<128x128xbf16>
      %c0_56 = arith.constant 0 : index
      %c0_57 = arith.constant 0 : index
      %74 = vector.load %arg15[%c0_56, %c0_57] : memref<128x128xbf16, #tpu.memory_space<vmem>>, vector<128x128xbf16>
      %cst_58 = arith.constant dense<0.000000e+00> : vector<128x128xf32>
      %75 = tpu.matmul %73, %74, %cst_58 {dimension_numbers = #tpu.dot_dimension_numbers<[1], [0], [0], [1], [0, 0, 1, 1], [], []>} : vector<128x128xbf16>, vector<128x128xbf16>, vector<128x128xf32> -> vector<128x128xf32>
      %c0_59 = arith.constant 0 : index
      %c0_60 = arith.constant 0 : index
      %76 = vector.load %arg16[%c0_59, %c0_60] : memref<1x128xf32, #tpu.memory_space<vmem>>, vector<1x128xf32>
      %77 = vector.broadcast %76 : vector<1x128xf32> to vector<128x128xf32>
      %78 = arith.addf %75, %77 : vector<128x128xf32>
      %79 = arith.truncf %78 : vector<128x128xf32> to vector<128x128xbf16>
      %c0_61 = arith.constant 0 : index
      %c0_62 = arith.constant 0 : index
      %80 = vector.load %arg17[%c0_61, %c0_62] : memref<128x128xbf16, #tpu.memory_space<vmem>>, vector<128x128xbf16>
      tpu.vector_store %arg17[%c0_61, %c0_62], %79 {strides = array<i32>} : memref<128x128xbf16, #tpu.memory_space<vmem>>, vector<128x128xbf16>,
    } else {
    }
    return
  }
  func.func @transform_0(%arg0: i32, %arg1: i32) -> (i32, i32) {
    %c0_i32 = arith.constant 0 : i32
    return %arg0, %arg1 : i32, i32
  }
  func.func @transform_1(%arg0: i32, %arg1: i32) -> (i32, i32) {
    %c0_i32 = arith.constant 0 : i32
    %c0_i32_0 = arith.constant 0 : i32
    return %arg0, %c0_i32 : i32, i32
  }
  func.func @transform_2(%arg0: i32, %arg1: i32) -> (i32, i32) {
    %c0_i32 = arith.constant 0 : i32
    %c0_i32_0 = arith.constant 0 : i32
    return %arg1, %c0_i32 : i32, i32
  }
  func.func @transform_3(%arg0: i32, %arg1: i32) -> (i32, i32) {
    %c0_i32 = arith.constant 0 : i32
    %c0_i32_0 = arith.constant 0 : i32
    %c0_i32_1 = arith.constant 0 : i32
    return %c0_i32, %c0_i32_0 : i32, i32
  }
  func.func @transform_4(%arg0: i32, %arg1: i32) -> (i32, i32) {
    %c0_i32 = arith.constant 0 : i32
    %c0_i32_0 = arith.constant 0 : i32
    %c0_i32_1 = arith.constant 0 : i32
    return %c0_i32, %c0_i32_0 : i32, i32
  }
  func.func @transform_5(%arg0: i32, %arg1: i32) -> (i32, i32) {
    %c0_i32 = arith.constant 0 : i32
    %c0_i32_0 = arith.constant 0 : i32
    %c0_i32_1 = arith.constant 0 : i32
    return %c0_i32, %c0_i32_0 : i32, i32
  }
  func.func @transform_6(%arg0: i32, %arg1: i32) -> (i32, i32) {
    %c0_i32 = arith.constant 0 : i32
    %c0_i32_0 = arith.constant 0 : i32
    %c0_i32_1 = arith.constant 0 : i32
    return %c0_i32, %c0_i32_0 : i32, i32
  }
  func.func @transform_7(%arg0: i32, %arg1: i32) -> (i32, i32) {
    %c0_i32 = arith.constant 0 : i32
    %c0_i32_0 = arith.constant 0 : i32
    %c0_i32_1 = arith.constant 0 : i32
    return %c0_i32, %c0_i32_0 : i32, i32
  }
  func.func @transform_8(%arg0: i32, %arg1: i32) -> (i32, i32) {
    %c0_i32 = arith.constant 0 : i32
    %c0_i32_0 = arith.constant 0 : i32
    %c0_i32_1 = arith.constant 0 : i32
    return %c0_i32, %c0_i32_0 : i32, i32
  }
  func.func @transform_9(%arg0: i32, %arg1: i32) -> (i32, i32, i32) {
    %c0_i32 = arith.constant 0 : i32
    %c0_i32_0 = arith.constant 0 : i32
    %c0_i32_1 = arith.constant 0 : i32
    %c0_i32_2 = arith.constant 0 : i32
    return %c0_i32, %c0_i32_0, %c0_i32_1 : i32, i32, i32
  }
  func.func @transform_10(%arg0: i32, %arg1: i32) -> (i32, i32, i32) {
    %c0_i32 = arith.constant 0 : i32
    %c0_i32_0 = arith.constant 0 : i32
    %c0_i32_1 = arith.constant 0 : i32
    %c0_i32_2 = arith.constant 0 : i32
    return %c0_i32, %c0_i32_0, %c0_i32_1 : i32, i32, i32
  }
  func.func @transform_11(%arg0: i32, %arg1: i32) -> (i32, i32, i32) {
    %c0_i32 = arith.constant 0 : i32
    %c0_i32_0 = arith.constant 0 : i32
    %c0_i32_1 = arith.constant 0 : i32
    %c0_i32_2 = arith.constant 0 : i32
    return %c0_i32, %c0_i32_0, %c0_i32_1 : i32, i32, i32
  }
  func.func @transform_12(%arg0: i32, %arg1: i32) -> (i32, i32, i32) {
    %c0_i32 = arith.constant 0 : i32
    %c0_i32_0 = arith.constant 0 : i32
    %c0_i32_1 = arith.constant 0 : i32
    %c0_i32_2 = arith.constant 0 : i32
    return %c0_i32, %c0_i32_0, %c0_i32_1 : i32, i32, i32
  }
  func.func @transform_13(%arg0: i32, %arg1: i32) -> (i32, i32) {
    %c0_i32 = arith.constant 0 : i32
    %c0_i32_0 = arith.constant 0 : i32
    %c0_i32_1 = arith.constant 0 : i32
    return %c0_i32, %c0_i32_0 : i32, i32
  }
  func.func @transform_14(%arg0: i32, %arg1: i32) -> (i32, i32) {
    %c0_i32 = arith.constant 0 : i32
    %c0_i32_0 = arith.constant 0 : i32
    %c0_i32_1 = arith.constant 0 : i32
    return %c0_i32, %c0_i32_0 : i32, i32
  }
  func.func @transform_15(%arg0: i32, %arg1: i32) -> (i32, i32) {
    %c0_i32 = arith.constant 0 : i32
    %c0_i32_0 = arith.constant 0 : i32
    return %arg0, %c0_i32 : i32, i32
  }
}

</mosaic_0001>

<bundles_post_ra>
// kernel: tpu_custom_call.1
= control target key start
LH: loop header
LB: loop body
LE: loop exit
PB: predicated region body
PF: predicated region fallthrough
CT: control target
= control target key end

     0   :  { %s4758_s0 = inlined_call_operand.hbm [shape: s8[256,256], index: 0, kind: input, shape index: {}]   ;;  %s4759_s1 = inlined_call_operand.hbm [shape: bf16[256,128], index: 1, kind: input, shape index: {}]   ;;  %s4760_s2 = inlined_call_operand.hbm [shape: bf16[256,128], index: 2, kind: input, shape index: {}]   ;;  %s4761_s3 = inlined_call_operand.vmem [shape: f32[1,128], index: 3, kind: input, shape index: {}]   ;;  %s4762_s4 = inlined_call_operand.hbm [shape: bf16[128,128], index: 4, kind: input, shape index: {}]   ;;  %s4763_s5 = inlined_call_operand.vmem [shape: f32[1,128], index: 5, kind: input, shape index: {}]   ;;  %s4764_s6 = inlined_call_operand.hbm [shape: bf16[128,128], index: 6, kind: input, shape index: {}]   ;;  %s4765_s7 = inlined_call_operand.hbm [shape: bf16[128,128], index: 7, kind: input, shape index: {}]   ;;  %s4766_s8 = inlined_call_operand.vmem [shape: f32[1,128], index: 8, kind: input, shape index: {}]   ;;  %s4767_s9 = inlined_call_operand.hbm [shape: bf16[2,128,128], index: 9, kind: input, shape index: {}]   ;;  %s4768_s10 = inlined_call_operand.vmem [shape: f32[2,1,128], index: 10, kind: input, shape index: {}]   ;;  %s4769_s11 = inlined_call_operand.vmem [shape: f32[2,1,128], index: 11, kind: input, shape index: {}]   ;;  %s4770_s12 = inlined_call_operand.vmem [shape: f32[2,1,128], index: 12, kind: input, shape index: {}]   ;;  %s4771_s13 = inlined_call_operand.hbm [shape: bf16[128,128], index: 13, kind: input, shape index: {}]   ;;  %s4772_s14 = inlined_call_operand.vmem [shape: f32[1,128], index: 14, kind: input, shape index: {}]   ;;  %s4773_s15 = inlined_call_operand.hbm [shape: bf16[256,128], index: 15, kind: output, shape index: {}]  }
   0x1   :  { %4808 = sst [smem:[#allocation40_spill]] %s4758_s0 }
   0x2   :  { %4809 = sst [smem:[#allocation41_spill]] %s4759_s1 }
   0x3   :  { %4810 = sst [smem:[#allocation42_spill]] %s4760_s2 }
   0x4   :  { %4811 = sst [smem:[#allocation43_spill]] %s4761_s3 }
   0x5   :  { %4812 = sst [smem:[#allocation44_spill]] %s4762_s4 }
   0x6   :  { %4813 = sst [smem:[#allocation45_spill]] %s4763_s5 }
   0x7   :  { %4814 = sst [smem:[#allocation46_spill]] %s4764_s6 }
   0x8   :  { %4815 = sst [smem:[#allocation47_spill]] %s4765_s7 }
   0x9   :  { %4816 = sst [smem:[#allocation48_spill]] %s4766_s8 }
   0xa   :  { %4817 = sst [smem:[#allocation49_spill]] %s4767_s9 }
   0xb   :  { %4818 = sst [smem:[#allocation50_spill]] %s4768_s10 }
   0xc   :  { %4819 = sst [smem:[#allocation51_spill]] %s4769_s11 }
   0xd   :  { %4820 = sst [smem:[#allocation52_spill]] %s4770_s12 }
   0xe   :  { %4821 = sst [smem:[#allocation53_spill]] %s4771_s13 }
   0xf   :  { %4822 = sst [smem:[#allocation54_spill]] %s4772_s14 }
  0x10   :  { %4823 = sst [smem:[#allocation55_spill]] %s4773_s15 }
  0x11   :  { %20 = vsyncpa [#allocation4], 0 }
  0x12   :  { %22 = vsyncpa [#allocation4 + $0x1], 0 }
  0x13   :  { %23 = vsyncpa [#allocation7], 0 }
  0x14   :  { %25 = vsyncpa [#allocation7 + $0x1], 0 }
  0x15   :  { %26 = vsyncpa [#allocation10], 0 }
  0x16   :  { %27 = vsyncpa [#allocation13], 0 }
  0x17   :  { %28 = vsyncpa [#allocation16], 0 }
  0x18   :  { %29 = vsyncpa [#allocation5], 0 }
  0x19   :  { %31 = vsyncpa [#allocation5 + $0x1], 0  ;;  %s3854_s18 = smov 0   ;;  %s3856_s19 = smov 0  }
  0x1a   :  { %s3858_s20 = smov 0   ;;  %s3860_s21 = smov 0  }
  0x1b   :  { %s3862_s22 = smov 0   ;;  %s3864_s23 = smov 0  }
  0x1c   :  { %s3866_s24 = smov 0   ;;  %s3868_s25 = smov 0  }
  0x1d   :  { %s3870_s26 = smov 0   ;;  %s3872_s27 = smov 0  }
  0x1e   :  { %s3874_s28 = smov 0   ;;  %s3876_s29 = smov 0  }
  0x1f   :  { %s3878_s30 = smov 0   ;;  %s3880_s16 = smov 0  }
  0x20 LB: > { %4824 = sst [smem:[#allocation25_spill]] %s3703_s18  ;;  %s3925_s17 = sadd.s32 4294967295, %s3755_s16   ;;  %s3755_s16 = sphi %s3880_s16, %s37_s16   ;;  %s3751_s30 = sphi %s3878_s30, %s4915_s30   ;;  %s3747_s29 = sphi %s3876_s29, %s4923_s29   ;;  %s3743_s28 = sphi %s3874_s28, %s4913_s28   ;;  %s3739_s27 = sphi %s3872_s27, %s4922_s27   ;;  %s3735_s26 = sphi %s3870_s26, %s4921_s26   ;;  %s3731_s25 = sphi %s3868_s25, %s4920_s25   ;;  %s3727_s24 = sphi %s3866_s24, %s4919_s24   ;;  %s3723_s23 = sphi %s3864_s23, %s4918_s23   ;;  %s3719_s22 = sphi %s3862_s22, %s4917_s22   ;;  %s3715_s21 = sphi %s3860_s21, %s4911_s21   ;;  %s3711_s20 = sphi %s3858_s20, %s4916_s20   ;;  %s3707_s19 = sphi %s3856_s19, %s4910_s19   ;;  %s3703_s18 = sphi %s3854_s18, %s4909_s18  }
  0x21   : > { %4825 = sst [smem:[#allocation26_spill]] %s3707_s19  ;;  %p2538_p0 = scmp.ge.s32.totalorder %s3755_s16, 1 }
  0x22   : > { %4826 = sst [smem:[#allocation27_spill]] %s3711_s20  ;;  %p4780_p1 = scmp.eq.s32.totalorder %s3925_s17, 0 }
  0x23   : > { %4827 = sst [smem:[#allocation28_spill]] %s3715_s21  ;;  %p412_p2 = scmp.lt.s32.totalorder %s3755_s16, 5 }
  0x24   : > { %4828 = sst [smem:[#allocation29_spill]] %s3719_s22  ;;  %s3758_s11 = smov [#allocation12]  }
  0x25   : > { %4829 = sst [smem:[#allocation30_spill]] %s3739_s27  ;;  %p3930_p3 = pnand %p2538_p0, %p412_p2 }
  0x26   : > { %4830 = sst [smem:[#allocation31_spill]] %s3743_s28  ;;  %s3757_s28 = smov [#allocation9]  }
  0x27   : > { %4831 = sst [smem:[#allocation32_spill]] %s3751_s30  ;;  %s427_s14 = sshll.u32 %s3757_s28, 4  ;;  %s428_s14 = int_to_ptr.vmem [resolvable:$true] %s427_s14 }
  0x28   : > { %s4832_s15 = scalar_select %p3930_p3, 1, 0 }
  0x29   : > { %p3128_p4 = pneg %p3930_p3  ;;  %s456_s10 = sshll.u32 %s3758_s11, 4  ;;  %s3942_s10 = int_to_ptr.vmem [resolvable:$true] %s456_s10 }
  0x2a   : > { %4833 = sst [smem:[#allocation33_spill]] %s4832_s15  ;;  %s4835_s4 = sld [smem:[#allocation44_spill]] }
  0x2b   : > { %p3938_p5 = pnand %p3128_p4, %p4780_p1 }
  0x2d   : > { %s4834_s12 = scalar_select %p3938_p5, 1, 0 }
  0x2e   : > { %p3952_p7 = pneg %p3938_p5 }
  0x30   : > { %s3359_s5 = scalar_lea.hbm %s4835_s4, 1024 }
  0x31   : > { %p3360_p6 = scmp.ne.s32.totalorder %s4835_s4, %s3359_s5  ;;  %p3366_p10 = scmp.lt.u32.totalorder %s3359_s5, %s4835_s4 }
  0x33   : > { %p3362_p8 = pnand %p3952_p7, %p3360_p6 }
  0x35   : > { %p3363_p9 = pneg %p3362_p8 }
  0x37   : > { %p3368_p11 = pnand %p3366_p10, %p3363_p9 }
  0x39   : > { %3371 = shalt.err (!%p3368_p11)
}
  0x3a   : > { %s3372_s3 = scalar_lea.vmem %s428_s14, 1024  ;;  %p3380_p2 = scmp.lt.s32.totalorder %s428_s14, %s428_s14 }
  0x3b   : > { %p3373_p12 = scmp.ne.s32.totalorder %s428_s14, %s3372_s3  ;;  %p3381_p4 = scmp.lt.s32.totalorder %s3372_s3, %s3372_s3 }
  0x3d   : > { %p3375_p13 = pnand %p3373_p12, %p3952_p7  ;;  %p3382_p1 = por %p3381_p4, %p3380_p2 }
  0x3f   : > { %p3376_p0 = pneg %p3375_p13 }
  0x41   : > { %p3383_p3 = pnand %p3382_p1, %p3376_p0 }
  0x43   : > { %3386 = shalt.err (!%p3383_p3)
}
  0x44   : > { %s4785_s2 = smov 64   ;;  %s4787_s8 = smov 4  }
  0x45   : > { %3131 = dma.hbm_to_vmem [thread:$0]  (!%p3938_p5), %s4835_s4, 1024, %s428_s14, [#allocation10], %s4785_s2, %s4785_s2, %s4787_s8  }
  0x46   : > { %s4837_s7 = sld [smem:[#allocation47_spill]] }
  0x4c   : > { %s3387_s18 = scalar_lea.hbm %s4837_s7, 1024 }
  0x4d   : > { %p3388_p1 = scmp.ne.s32.totalorder %s4837_s7, %s3387_s18  ;;  %p3394_p8 = scmp.lt.u32.totalorder %s3387_s18, %s4837_s7 }
  0x4f   : > { %p3390_p3 = pnand %p3388_p1, %p3952_p7 }
  0x51   : > { %p3391_p6 = pneg %p3390_p3 }
  0x53   : > { %p3396_p9 = pnand %p3394_p8, %p3391_p6 }
  0x55   : > { %3399 = shalt.err (!%p3396_p9)
}
  0x56   : > { %s3400_s14 = scalar_lea.vmem %s3942_s10, 1024  ;;  %p3408_p13 = scmp.lt.s32.totalorder %s3942_s10, %s3942_s10 }
  0x57   : > { %p3401_p10 = scmp.ne.s32.totalorder %s3942_s10, %s3400_s14  ;;  %p3409_p0 = scmp.lt.s32.totalorder %s3400_s14, %s3400_s14 }
  0x59   : > { %p3403_p11 = pnand %p3401_p10, %p3952_p7  ;;  %p3410_p2 = por %p3409_p0, %p3408_p13 }
  0x5b   : > { %p3404_p12 = pneg %p3403_p11 }
  0x5d   : > { %p3411_p4 = pnand %p3410_p2, %p3404_p12 }
  0x5f   : > { %3414 = shalt.err (!%p3411_p4)
}
  0x60   : > { %3137 = dma.hbm_to_vmem [thread:$0]  (!%p3938_p5), %s4837_s7, 1024, %s3942_s10, [#allocation13], %s4785_s2, %s4785_s2, %s4787_s8  }
  0x61   : > { %s2537_s19 = sadd.s32 4294967294, %s3755_s16   ;;  %p4791_p1 = scmp.eq.s32.totalorder %s3755_s16, 0 }
  0x62   : > { %p91_p3 = scmp.ne.s32.totalorder %s3723_s23, %s3719_s22  ;;  %p97_p6 = scmp.ne.s32.totalorder %s3719_s22, %s3715_s21 }
  0x63   : > { %p399_p8 = scmp.eq.s32.totalorder %s3925_s17, 3  ;;  %p405_p9 = scmp.eq.s32.totalorder %s2537_s19, 3 }
  0x64   : > { %p93_p10 = por %p91_p3, %p4791_p1  ;;  %p4838_p11 = scmp.eq.s32.totalorder %s3925_s17, 0 }
  0x65   : > { %p4014_p13 = por %p399_p8, %p91_p3  ;;  %p4018_p0 = por %p405_p9, %p97_p6 }
  0x66   : > { %p4010_p12 = por %p97_p6, %p4838_p11  ;;  %p4790_p2 = scmp.lt.s32.totalorder %s3755_s16, 4 }
  0x67   : > { %s4841_s27 = scalar_select %p4014_p13, 1, 0 }
  0x68   : > { %s4839_s15 = scalar_select %p4010_p12, 1, 0 }
  0x69   : > { %4842 = sst [smem:[#allocation35_spill]] %s4841_s27  ;;  %s534_s11 = sand.u32 1, %s3755_s16  }
  0x6a   : > { %4840 = sst [smem:[#allocation34_spill]] %s4839_s15  ;;  %s536_s3 = sand.u32 1, %s3723_s23  }
  0x6b   : > { %s4843_s10 = scalar_select %p4018_p0, 1, 0 }
  0x6c   : > { %s2549_s14 = sshll.u32 %s536_s3, 6  ;;  %s2666_s0 = sshll.u32 %s3751_s30, 10 }
  0x6d   : > { %4844 = sst [smem:[#allocation36_spill]] %s4843_s10  ;;  %s4845_s1 = sld [smem:[#allocation41_spill]] }
  0x6e   : > { %s538_s20 = scalar_lea.vmem [#allocation6], %s2549_s14  ;;  %p4033_p4 = pnand %p4790_p2, %p93_p10 }
  0x6f   : > { %s545_s2 = sshll.u32 %s538_s20, 4  ;;  %s3761_s3 = smov [#allocation11]   ;;  %s4037_s2 = int_to_ptr.vmem [resolvable:$true] %s545_s2 }
  0x70   : > { %s4039_s4 = sshll.u32 %s3761_s3, 4  ;;  %p3417_p6 = pneg %p4033_p4  ;;  %s444_s4 = int_to_ptr.vmem [resolvable:$true] %s4039_s4 }
  0x73   : > { %s4029_s5 = scalar_lea.hbm %s4845_s1, %s2666_s0  ;;  %s4041_s0 = scalar_lea.sflag [#allocation7], %s534_s11 }
  0x74   : > { %s3415_s18 = scalar_lea.hbm %s4029_s5, 1024  ;;  %s3420_s19 = scalar_lea.hbm %s4845_s1, 2048 }
  0x75   : > { %p3416_p3 = scmp.ne.s32.totalorder %s4029_s5, %s3415_s18  ;;  %p3421_p10 = scmp.lt.u32.totalorder %s4029_s5, %s4845_s1 }
  0x76   : > { %p3422_p11 = scmp.lt.u32.totalorder %s3420_s19, %s3415_s18  ;;  %p3424_p1 = scmp.lt.u32.totalorder %s3415_s18, %s4029_s5 }
  0x77   : > { %p3418_p8 = pnand %p3417_p6, %p3416_p3 }
  0x78   : > { %p3423_p2 = por %p3422_p11, %p3421_p10 }
  0x79   : > { %p3419_p9 = pneg %p3418_p8 }
  0x7a   : > { %p3425_p0 = por %p3424_p1, %p3423_p2 }
  0x7c   : > { %p3426_p13 = pnand %p3425_p0, %p3419_p9 }
  0x7e   : > { %3429 = shalt.err (!%p3426_p13)
}
  0x7f   : > { %s3430_s11 = scalar_lea.vmem %s4037_s2, 1024  ;;  %s3762_s3 = smov [#allocation6]  }
  0x80   : > { %p3431_p3 = scmp.ne.s32.totalorder %s4037_s2, %s3430_s11  ;;  %s3435_s20 = sshll.u32 %s3762_s3, 4  ;;  %s3436_s20 = int_to_ptr.vmem [resolvable:$false] %s3435_s20 }
  0x81   : > { %s3437_s7 = scalar_lea.vmem %s3436_s20, 2048  ;;  %p3438_p5 = scmp.lt.s32.totalorder %s4037_s2, %s3436_s20 }
  0x82   : > { %p3433_p8 = pnand %p3431_p3, %p3417_p6  ;;  %p3439_p10 = scmp.lt.s32.totalorder %s3437_s7, %s3430_s11 }
  0x84   : > { %p3434_p12 = pneg %p3433_p8  ;;  %p3440_p11 = por %p3439_p10, %p3438_p5 }
  0x86   : > { %p3441_p1 = pnand %p3440_p11, %p3434_p12 }
  0x88   : > { %3444 = shalt.err (!%p3441_p1)
}
  0x89   : > { %s4847_s10 = smov 4   ;;  %s4848_s18 = smov 64  }
  0x8a   : > { %3150 = dma.hbm_to_vmem [thread:$0]  (!%p4033_p4), %s4029_s5, 1024, %s4037_s2, %s4041_s0, %s4848_s18, %s4848_s18, %s4847_s10  }
  0x8b   : > { %s4849_s6 = sld [smem:[#allocation46_spill]] }
  0x91   : > { %s3445_s3 = scalar_lea.hbm %s4849_s6, 1024 }
  0x92   : > { %p3446_p5 = scmp.ne.s32.totalorder %s4849_s6, %s3445_s3  ;;  %p3452_p0 = scmp.lt.u32.totalorder %s3445_s3, %s4849_s6 }
  0x94   : > { %p3448_p12 = pnand %p3446_p5, %p3952_p7 }
  0x96   : > { %p3449_p13 = pneg %p3448_p12 }
  0x98   : > { %p3454_p2 = pnand %p3452_p0, %p3449_p13 }
  0x9a   : > { %3457 = shalt.err (!%p3454_p2)
}
  0x9b   : > { %s3458_s1 = scalar_lea.vmem %s444_s4, 1024  ;;  %p3466_p3 = scmp.lt.s32.totalorder %s444_s4, %s444_s4 }
  0x9c   : > { %p3459_p4 = scmp.ne.s32.totalorder %s444_s4, %s3458_s1  ;;  %p3467_p8 = scmp.lt.s32.totalorder %s3458_s1, %s3458_s1 }
  0x9e   : > { %p3461_p6 = pnand %p3459_p4, %p3952_p7  ;;  %p3468_p10 = por %p3467_p8, %p3466_p3 }
  0xa0   : > { %p3462_p9 = pneg %p3461_p6 }
  0xa2   : > { %p3469_p11 = pnand %p3468_p10, %p3462_p9 }
  0xa4   : > { %3472 = shalt.err (!%p3469_p11)
}
  0xa5   : > { %p4850_p1 = scmp.ne.s32.totalorder %s4834_s12, 0  ;;  %s3763_s14 = smov [#allocation14]  }
  0xa6   : > { %s472_s19 = sshll.u32 %s3763_s14, 4  ;;  %s3764_s3 = smov [#allocation15]   ;;  %s473_s19 = int_to_ptr.vmem [resolvable:$true] %s472_s19 }
  0xa7   : > { %3134 = dma.hbm_to_vmem [thread:$0]  (!%p4850_p1), %s4849_s6, 1024, %s444_s4, [#allocation10], %s4848_s18, %s4848_s18, %s4847_s10  }
  0xa8   : > { %s494_s11 = sshll.u32 %s3764_s3, 4  ;;  %s4851_s9 = sld [smem:[#allocation49_spill]]  ;;  %s495_s11 = int_to_ptr.vmem [resolvable:$true] %s494_s11 }
  0xae   : > { %s3473_s8 = scalar_lea.hbm %s4851_s9, 2048 }
  0xaf   : > { %p3474_p5 = scmp.ne.s32.totalorder %s4851_s9, %s3473_s8  ;;  %p3480_p0 = scmp.lt.u32.totalorder %s3473_s8, %s4851_s9 }
  0xb1   : > { %p3476_p12 = pnand %p3474_p5, %p3952_p7 }
  0xb3   : > { %p3477_p13 = pneg %p3476_p12 }
  0xb5   : > { %p3482_p2 = pnand %p3480_p0, %p3477_p13 }
  0xb7   : > { %3485 = shalt.err (!%p3482_p2)
}
  0xb8   : > { %s3486_s4 = scalar_lea.vmem %s473_s19, 2048  ;;  %p3494_p3 = scmp.lt.s32.totalorder %s473_s19, %s473_s19 }
  0xb9   : > { %p3487_p4 = scmp.ne.s32.totalorder %s473_s19, %s3486_s4  ;;  %p3495_p8 = scmp.lt.s32.totalorder %s3486_s4, %s3486_s4 }
  0xbb   : > { %p3489_p6 = pnand %p3487_p4, %p3952_p7  ;;  %p3496_p10 = por %p3495_p8, %p3494_p3 }
  0xbd   : > { %p3490_p9 = pneg %p3489_p6 }
  0xbf   : > { %p3497_p11 = pnand %p3496_p10, %p3490_p9 }
  0xc1   : > { %3500 = shalt.err (!%p3497_p11)
}
  0xc2   : > { %3140 = dma.hbm_to_vmem [thread:$0]  (!%p4850_p1), %s4851_s9, 2048, %s473_s19, [#allocation13], %s4848_s18, %s4848_s18, %s4847_s10  }
  0xc3   : > { %s4852_s13 = sld [smem:[#allocation53_spill]] }
  0xc9   : > { %s3501_s3 = scalar_lea.hbm %s4852_s13, 1024 }
  0xca   : > { %p3502_p5 = scmp.ne.s32.totalorder %s4852_s13, %s3501_s3  ;;  %p3508_p0 = scmp.lt.u32.totalorder %s3501_s3, %s4852_s13 }
  0xcc   : > { %p3504_p12 = pnand %p3502_p5, %p3952_p7 }
  0xce   : > { %p3505_p13 = pneg %p3504_p12 }
  0xd0   : > { %p3510_p2 = pnand %p3508_p0, %p3505_p13 }
  0xd2   : > { %3513 = shalt.err (!%p3510_p2)
}
  0xd3   : > { %s3514_s2 = scalar_lea.vmem %s495_s11, 1024  ;;  %p3522_p3 = scmp.lt.s32.totalorder %s495_s11, %s495_s11 }
  0xd4   : > { %p3515_p4 = scmp.ne.s32.totalorder %s495_s11, %s3514_s2  ;;  %p3523_p8 = scmp.lt.s32.totalorder %s3514_s2, %s3514_s2 }
  0xd6   : > { %p3517_p6 = pnand %p3515_p4, %p3952_p7  ;;  %p3524_p10 = por %p3523_p8, %p3522_p3 }
  0xd8   : > { %p3518_p9 = pneg %p3517_p6 }
  0xda   : > { %p3525_p11 = pnand %p3524_p10, %p3518_p9 }
  0xdc   : > { %3528 = shalt.err (!%p3525_p11)
}
  0xdd   : > { %3143 = dma.hbm_to_vmem [thread:$0]  (!%p4850_p1), %s4852_s13, 1024, %s495_s11, [#allocation16], %s4848_s18, %s4848_s18, %s4847_s10  }
  0xde   : > { %s46_s12 = sadd.s32 1, %s3747_s29  ;;  %s58_s28 = sadd.s32 1, %s3735_s26 }
  0xdf   : > { %p47_p7 = scmp.ge.s32.totalorder %s46_s12, 2  ;;  %p65_p5 = scmp.ne.s32.totalorder %s3735_s26, %s3731_s25 }
  0xe0   : > { %p71_p12 = scmp.ne.s32.totalorder %s3731_s25, %s3727_s24  ;;  %s4854_s21 = sadd.s32 1, %s3751_s30 }
  0xe1   : > { %s4925_s12 = smov (%p47_p7, %s46_s12), 0  ;;  %s4927_s21 = smov (!%p47_p7, %s4854_s21), %s3751_s30 }
  0xe2   : > { %4853 = sst [smem:[#allocation37_spill]] %s4925_s12  ;;  %s4149_s27 = ssub.s32 %s3747_s29, %s4925_s12 }
  0xe3   : > { %p4855_p13 = scmp.eq.s32.totalorder %s3755_s16, 0  ;;  %p51_p0 = scmp.ge.s32.totalorder %s4927_s21, 2 }
  0xe4   : > { %p4857_p2 = scmp.eq.s32.totalorder %s3925_s17, 0  ;;  %s511_s5 = sand.u32 1, %s3735_s26  }
  0xe5   : > { %p4153_p1 = por %p4855_p13, %p65_p5  ;;  %s4929_s21 = smov (%p51_p0, %s4927_s21), 0 }
  0xe6   : > { %p4159_p4 = por %p4857_p2, %p71_p12  ;;  %4859 = sst [smem:[#allocation38_spill]] %s4929_s21 }
  0xe7   : > { %s2545_s14 = sshll.u32 %s511_s5, 5  ;;  %s53_s3 = ssub.s32 %s3751_s30, %s4929_s21 }
  0xe8   : > { %s55_s20 = sor.u32 %s4149_s27, %s53_s3  ;;  %p82_p9 = scmp.eq.s32.totalorder %s53_s3, 0 }
  0xe9   : > { %p56_p3 = scmp.eq.s32.totalorder %s55_s20, 0  ;;  %s2665_s1 = sshll.u32 %s3751_s30, 3 }
  0xea   : > { %s4860_s8 = sadd.s32 1, %s3723_s23  ;;  %s521_s19 = sadd.s32 %s3747_s29, %s2665_s1 }
  0xeb   : > { %s4174_s7 = scalar_select %p82_p9, %s3723_s23, %s4860_s8  }
  0xec   : > { %s4177_s2 = scalar_select %p56_p3, %s3735_s26, %s58_s28  }
  0xed   : > { %s515_s4 = scalar_lea.vmem [#allocation3], %s2545_s14  ;;  %s2548_s9 = sshll.u32 %s521_s19, 7 }
  0xee   : > { %4861 = sst [smem:[#allocation39_spill]] %s4177_s2  ;;  %s524_s6 = sshll.u32 %s515_s4, 4  ;;  %s4180_s6 = int_to_ptr.vmem [resolvable:$true] %s524_s6 }
  0xef   : > { %s4862_s15 = sld [smem:[#allocation40_spill]]  ;;  %p4863_p8 = scmp.lt.s32.totalorder %s3755_s16, 4 }
  0xf0   : > { %s4195_s14 = scalar_lea.sflag [#allocation4], %s511_s5 }
  0xf1   : > { %p4191_p10 = pnand %p4863_p8, %p4153_p1 }
  0xf3   : > { %p3531_p7 = pneg %p4191_p10 }
  0xf5   : > { %s4185_s22 = scalar_lea.hbm %s4862_s15, %s2548_s9  ;;  %s3534_s12 = scalar_lea.hbm %s4862_s15, 2048 }
  0xf6   : > { %s3529_s3 = scalar_lea.hbm %s4185_s22, 512  ;;  %p3535_p13 = scmp.lt.u32.totalorder %s4185_s22, %s4862_s15 }
  0xf7   : > { %p3530_p11 = scmp.ne.s32.totalorder %s4185_s22, %s3529_s3  ;;  %p3536_p1 = scmp.lt.u32.totalorder %s3534_s12, %s3529_s3 }
  0xf8   : > { %p3538_p2 = scmp.lt.u32.totalorder %s3529_s3, %s4185_s22 }
  0xf9   : > { %p3532_p5 = pnand %p3531_p7, %p3530_p11  ;;  %p3537_p0 = por %p3536_p1, %p3535_p13 }
  0xfb   : > { %p3533_p12 = pneg %p3532_p5  ;;  %p3539_p9 = por %p3538_p2, %p3537_p0 }
  0xfd   : > { %p3540_p3 = pnand %p3539_p9, %p3533_p12 }
  0xff   : > { %3543 = shalt.err (!%p3540_p3)
}
 0x100   : > { %s3544_s5 = scalar_lea.vmem %s4180_s6, 512  ;;  %s3765_s1 = smov [#allocation3]  }
 0x101   : > { %p3545_p8 = scmp.ne.s32.totalorder %s4180_s6, %s3544_s5  ;;  %s3549_s8 = sshll.u32 %s3765_s1, 4  ;;  %s3550_s8 = int_to_ptr.vmem [resolvable:$false] %s3549_s8 }
 0x102   : > { %s3551_s19 = scalar_lea.vmem %s3550_s8, 1024  ;;  %p3552_p6 = scmp.lt.s32.totalorder %s4180_s6, %s3550_s8 }
 0x103   : > { %p3547_p11 = pnand %p3545_p8, %p3531_p7  ;;  %p3553_p13 = scmp.lt.s32.totalorder %s3551_s19, %s3544_s5 }
 0x105   : > { %p3548_p5 = pneg %p3547_p11  ;;  %p3554_p1 = por %p3553_p13, %p3552_p6 }
 0x107   : > { %p3555_p0 = pnand %p3554_p1, %p3548_p5 }
 0x109   : > { %3558 = shalt.err (!%p3555_p0)
}
 0x10a   : > { %s3766_s4 = smov 256   ;;  %s4865_s3 = sld [smem:[#allocation27_spill]] }
 0x10b   : > { %s4866_s9 = sld [smem:[#allocation26_spill]]  ;;  %s4867_s13 = sld [smem:[#allocation25_spill]] }
 0x10c   : > { %s3767_s12 = smov 128   ;;  %s3768_s11 = smov 8  }
 0x10d   : > { %3147 = dma.hbm_to_vmem [thread:$0]  (!%p4191_p10), %s4185_s22, 512, %s4180_s6, %s4195_s14, %s3766_s4, %s3767_s12, %s3768_s11  }
 0x10e   : > { %p4868_p7 = scmp.eq.s32.totalorder %s4149_s27, 0  ;;  %p4869_p12 = scmp.eq.s32.totalorder %s3755_s16, 0 }
 0x10f   : > { %s2667_s8 = sshll.u32 %s3747_s29, 10  ;;  %p4870_p3 = scmp.eq.s32.totalorder %s3925_s17, 0 }
 0x110   : > { %s110_s20 = sadd.s32 1, %s4865_s3  ;;  %s557_s1 = sand.u32 1, %s4865_s3  }
 0x111   : > { %p117_p6 = scmp.ne.s32.totalorder %s4865_s3, %s4866_s9  ;;  %p123_p9 = scmp.ne.s32.totalorder %s4866_s9, %s4867_s13 }
 0x112   : > { %s4229_s5 = scalar_select %p4868_p7, %s4865_s3, %s110_s20  }
 0x113   : > { %p119_p2 = por %p117_p6, %p4869_p12  ;;  %p4239_p8 = por %p123_p9, %p4870_p3 }
 0x114   : > { %s2552_s15 = sshll.u32 %s557_s1, 6  ;;  %s4872_s28 = sld [smem:[#allocation42_spill]] }
 0x115   : > { %s4871_s19 = scalar_select %p4239_p8, 1, 0 }
 0x116   : > { %s559_s22 = scalar_lea.vmem [#allocation8], %s2552_s15  ;;  %p4874_p10 = scmp.lt.s32.totalorder %s3755_s16, 4 }
 0x117   : > { %s566_s27 = sshll.u32 %s559_s22, 4  ;;  %s4254_s27 = int_to_ptr.vmem [resolvable:$true] %s566_s27 }
 0x118   : > { %p4250_p11 = pnand %p4874_p10, %p119_p2 }
 0x11a   : > { %s4873_s2 = smov %s4872_s28  ;;  %s4246_s6 = scalar_lea.hbm %s4872_s28, %s2667_s8 }
 0x11b   : > { %s3559_s4 = scalar_lea.hbm %s4246_s6, 1024  ;;  %p3561_p13 = pneg %p4250_p11 }
 0x11c   : > { %p3560_p5 = scmp.ne.s32.totalorder %s4246_s6, %s3559_s4  ;;  %s3564_s21 = scalar_lea.hbm %s4873_s2, 2048 }
 0x11d   : > { %p3565_p6 = scmp.lt.u32.totalorder %s4246_s6, %s4873_s2  ;;  %p3566_p7 = scmp.lt.u32.totalorder %s3564_s21, %s3559_s4 }
 0x11e   : > { %p3562_p1 = pnand %p3561_p13, %p3560_p5  ;;  %p3568_p2 = scmp.lt.u32.totalorder %s3559_s4, %s4246_s6 }
 0x11f   : > { %p3567_p12 = por %p3566_p7, %p3565_p6 }
 0x120   : > { %p3563_p0 = pneg %p3562_p1 }
 0x121   : > { %p3569_p9 = por %p3568_p2, %p3567_p12 }
 0x123   : > { %p3570_p3 = pnand %p3569_p9, %p3563_p0 }
 0x125   : > { %3573 = shalt.err (!%p3570_p3)
}
 0x126   : > { %s3574_s13 = scalar_lea.vmem %s4254_s27, 1024  ;;  %s3769_s12 = smov [#allocation8]  }
 0x127   : > { %p3575_p10 = scmp.ne.s32.totalorder %s4254_s27, %s3574_s13  ;;  %s3579_s11 = sshll.u32 %s3769_s12, 4  ;;  %s3580_s11 = int_to_ptr.vmem [resolvable:$false] %s3579_s11 }
 0x128   : > { %s3581_s20 = scalar_lea.vmem %s3580_s11, 2048  ;;  %p3582_p8 = scmp.lt.s32.totalorder %s4254_s27, %s3580_s11 }
 0x129   : > { %p3577_p5 = pnand %p3575_p10, %p3561_p13  ;;  %p3583_p6 = scmp.lt.s32.totalorder %s3581_s20, %s3574_s13 }
 0x12b   : > { %p3578_p1 = pneg %p3577_p5  ;;  %p3584_p7 = por %p3583_p6, %p3582_p8 }
 0x12d   : > { %p3585_p12 = pnand %p3584_p7, %p3578_p1 }
 0x12f   : > { %3588 = shalt.err (!%p3585_p12)
}
 0x130   : > { %3153 = dma.hbm_to_vmem [thread:$0]  (!%p4250_p11), %s4246_s6, 1024, %s4254_s27, %s4041_s0, %s4848_s18, %s4848_s18, %s4847_s10  }
 0x131   : > { %s4876_s1 = sld [smem:[#allocation33_spill]] }
 0x137   : > { %p4877_p13 = scmp.ne.s32.totalorder %s4876_s1, 0 }
 0x138   : > { %s580_s8 = sand.u32 (!%p4877_p13), 1, %s3731_s25  }
 0x139   : > { %578 = sbr.rel (%p4877_p13) target bundleno = 1816 (0x718), region = 80  ;;  %s2556_s28 = sshll.u32 (!%p4877_p13), %s580_s8, 5 }
 0x13a   : > { %s581_s22 = scalar_lea.sflag (!%p4877_p13), [#allocation4], %s580_s8  ;;  %s4288_s4 = scalar_lea.vmem (!%p4877_p13), [#allocation3], %s2556_s28 }
 0x140   : > { %3674 = dma.done.wait (%p4159_p4), %s581_s22, 512  }
 0x141   : > { %3676 = vsyncadd (%p4159_p4), %s581_s22, 4294966784  ;;  %s4878_s14 = sld [smem:[#allocation29_spill]]  ;;  %s4879_s30 = sld [smem:[#allocation34_spill]] }
 0x142   : > { %s589_s0 = sand.u32 1, %s3925_s17  }
 0x143   : > { %s590_s6 = scalar_lea.sflag [#allocation7], %s589_s0 }
 0x147   : > { %s591_s10 = sand.u32 1, %s4878_s14   ;;  %p4880_p8 = scmp.ne.s32.totalorder %s4879_s30, 0 }
 0x148   : > { %s2557_s18 = sshll.u32 %s591_s10, 6 }
 0x149   : > { %s4298_s27 = scalar_lea.vmem [#allocation6], %s2557_s18 }
 0x14a   : > { %3678 = dma.done.wait (%p4880_p8), %s590_s6, 1024  }
 0x14b   : > { %3680 = vsyncadd (%p4880_p8), %s590_s6, 4294966272  ;;  %s4881_s15 = sld [smem:[#allocation26_spill]]  ;;  %p4882_p4 = scmp.ne.s32.totalorder %s4871_s19, 0 }
 0x151   : > { %s600_s24 = sand.u32 1, %s4881_s15  }
 0x152   : > { %s2558_s21 = sshll.u32 %s600_s24, 6 }
 0x153   : > { %s4305_s3 = scalar_lea.vmem [#allocation8], %s2558_s21 }
 0x154   : > { %3682 = dma.done.wait (%p4882_p4), %s590_s6, 1024  }
 0x155   : > { %3684 = vsyncadd (%p4882_p4), %s590_s6, 4294966272  ;;  %p4883_p11 = scmp.eq.s32.totalorder %s3925_s17, 0 }
 0x157   : > { %3686 = dma.done.wait (%p4883_p11), [#allocation10], 2048   ;;  %p4884_p0 = pmov %p4883_p11 }
 0x159   : > { %3688 = vsyncadd (%p4884_p0), [#allocation10], 4294965248  ;;  %p4885_p2 = pmov %p4884_p0 }
 0x15a   : > { %p4886_p9 = pmov %p4884_p0 }
 0x15b   : > { %3690 = dma.done.wait (%p4885_p2), [#allocation13], 3072  }
 0x15c   : > { %3692 = vsyncadd (%p4886_p9), [#allocation13], 4294964224  ;;  %p4887_p3 = pmov %p4884_p0 }
 0x15d   : > { %p4888_p10 = pmov %p4884_p0 }
 0x15e   : > { %3694 = dma.done.wait (%p4887_p3), [#allocation16], 1024  }
 0x15f   : > { %3696 = vsyncadd (%p4888_p10), [#allocation16], 4294966272  ;;  %s4323_s19 = scalar_lea.vmem [#allocation17], %s2557_s18  ;;  %s4889_s9 = sld [smem:[#allocation30_spill]] }
 0x165   : > { %p2565_p5 = scmp.ne.s32.totalorder %s4889_s9, 0 }
 0x166   : > { %v3770_v0 = vmov (!%p2565_p5), 0.0  }
 0x167   : > { %687 = sbr.rel (%p2565_p5) target bundleno = 367 (0x16f), region = 116  ;;  %688 = vst [vmem:[#allocation2] sm:$0xff] (!%p2565_p5), %v3770_v0  ;;  %689 = vst [vmem:[#allocation2 + $0x8] sm:$0xff] (!%p2565_p5), %v3770_v0 }
 0x168   : > { %690 = vst [vmem:[#allocation2 + $0x10] sm:$0xff] (!%p2565_p5), %v3770_v0  ;;  %691 = vst [vmem:[#allocation2 + $0x18] sm:$0xff] (!%p2565_p5), %v3770_v0 }
 0x169   : > { %692 = vst [vmem:[#allocation2 + $0x20] sm:$0xff] (!%p2565_p5), %v3770_v0  ;;  %693 = vst [vmem:[#allocation2 + $0x28] sm:$0xff] (!%p2565_p5), %v3770_v0 }
 0x16a   : > { %694 = vst [vmem:[#allocation2 + $0x30] sm:$0xff] (!%p2565_p5), %v3770_v0  ;;  %695 = vst [vmem:[#allocation2 + $0x38] sm:$0xff] (!%p2565_p5), %v3770_v0 }
 0x16b   : > { %696 = vst [vmem:[#allocation2 + $0x40] sm:$0xff] (!%p2565_p5), %v3770_v0  ;;  %697 = vst [vmem:[#allocation2 + $0x48] sm:$0xff] (!%p2565_p5), %v3770_v0 }
 0x16c   : > { %698 = vst [vmem:[#allocation2 + $0x50] sm:$0xff] (!%p2565_p5), %v3770_v0  ;;  %699 = vst [vmem:[#allocation2 + $0x58] sm:$0xff] (!%p2565_p5), %v3770_v0 }
 0x16d   : > { %700 = vst [vmem:[#allocation2 + $0x60] sm:$0xff] (!%p2565_p5), %v3770_v0  ;;  %701 = vst [vmem:[#allocation2 + $0x68] sm:$0xff] (!%p2565_p5), %v3770_v0 }
 0x16e   : > { %702 = vst [vmem:[#allocation2 + $0x70] sm:$0xff] %v3770_v0  ;;  %703 = vst [vmem:[#allocation2 + $0x78] sm:$0xff] %v3770_v0 }
 0x16f PF: > { %v3295_v1 = vld [vmem:[%s4305_s3] sm:$0xff]   ;;  %v3296_v2 = vld [vmem:[%s4305_s3 + $0x8] sm:$0xff]   ;;  %v3297_v3 = vld [vmem:[%s4305_s3 + $0x10] sm:$0xff]   ;;  %s4890_s17 = sld [smem:[#allocation30_spill]] }
 0x170   : > { %2844 = vmatprep.subr.bf16.mxu0 %v3295_v1  ;;  %3068 = vmatprep.subr.bf16.mxu1 %v3295_v1  ;;  %v3298_v4 = vld [vmem:[%s4305_s3 + $0x18] sm:$0xff]   ;;  %v704_v5 = vld [vmem:[%s4288_s4] sm:$0xff]  ;;  %v706_v6 = vld [vmem:[%s4288_s4 + $0x10] sm:$0xff] }
 0x171   : > { %2845 = vmatpush3.bf16.msra.mxu0 %v3295_v1  ;;  %3076 = vmatpush3.bf16.msra.mxu1 %v3295_v1  ;;  %v708_v7 = vunpack.c.l.s8.bf16 %v704_v5  ;;  %v712_v8 = vunpack.c.l.s8.bf16 %v706_v6  ;;  %v3299_v9 = vld [vmem:[%s4305_s3 + $0x20] sm:$0xff]   ;;  %v3300_v10 = vld [vmem:[%s4305_s3 + $0x28] sm:$0xff]   ;;  %v3301_v11 = vld [vmem:[%s4305_s3 + $0x30] sm:$0xff]   ;;  %v709_v15 = vunpack.c.h.s8.bf16 %v704_v5  ;;  %v713_v16 = vunpack.c.h.s8.bf16 %v706_v6 }
 0x172   : > { %2846 = vmatprep.subr.bf16.mxu0 %v3296_v2  ;;  %3069 = vmatprep.subr.bf16.mxu1 %v3296_v2  ;;  %v3302_v12 = vld [vmem:[%s4305_s3 + $0x38] sm:$0xff]   ;;  %v705_v13 = vld [vmem:[%s4288_s4 + $0x8] sm:$0xff]  ;;  %v718_v21 = vld [vmem:[#allocation2 + $0x10] sm:$0xff] }
 0x173   : > { %2860 = vmatprep.mubr.bf16.mxu0 %v708_v7  ;;  %2868 = vmatprep.mubr.bf16.mxu1 %v712_v8  ;;  %v707_v14 = vld [vmem:[%s4288_s4 + $0x18] sm:$0xff]  ;;  %v710_v17 = vunpack.c.l.s8.bf16 %v705_v13  ;;  %v711_v19 = vunpack.c.h.s8.bf16 %v705_v13  ;;  %v716_v23 = vld [vmem:[#allocation2] sm:$0xff]  ;;  %v717_v33 = vld [vmem:[#allocation2 + $0x8] sm:$0xff] }
 0x174   : > { %v714_v18 = vunpack.c.l.s8.bf16 %v707_v14  ;;  %v715_v20 = vunpack.c.h.s8.bf16 %v707_v14  ;;  %v726_v22 = vld [vmem:[#allocation2 + $0x50] sm:$0xff]  ;;  %v724_v24 = vld [vmem:[#allocation2 + $0x40] sm:$0xff]  ;;  %v719_v27 = vld [vmem:[#allocation2 + $0x18] sm:$0xff] }
 0x175   : > { %2847 = vmatpush3.bf16.msra.mxu0 %v3296_v2  ;;  %3077 = vmatpush3.bf16.msra.mxu1 %v3296_v2  ;;  %v727_v28 = vld [vmem:[#allocation2 + $0x58] sm:$0xff]  ;;  %v725_v34 = vld [vmem:[#allocation2 + $0x48] sm:$0xff]  ;;  %v722_v45 = vld [vmem:[#allocation2 + $0x30] sm:$0xff]  ;;  %p2574_p1 = scmp.ne.s32.totalorder %s4890_s17, 1 }
 0x176   : > { %2848 = vmatprep.subr.bf16.mxu0 %v3297_v3  ;;  %3070 = vmatprep.subr.bf16.mxu1 %v3297_v3  ;;  %v730_v46 = vld [vmem:[#allocation2 + $0x70] sm:$0xff]  ;;  %v720_v47 = vld [vmem:[#allocation2 + $0x20] sm:$0xff]  ;;  %v723_v51 = vld [vmem:[#allocation2 + $0x38] sm:$0xff]  ;;  %s4891_s11 = sld [smem:[#allocation45_spill]] (!%p2574_p1)  ;;  %s4892_s8 = sld [smem:[#allocation43_spill]] (!%p2574_p1) }
 0x177   : > { %v728_v48 = vld [vmem:[#allocation2 + $0x60] sm:$0xff]  ;;  %v731_v52 = vld [vmem:[#allocation2 + $0x78] sm:$0xff]  ;;  %v721_v57 = vld [vmem:[#allocation2 + $0x28] sm:$0xff]  ;;  %s4893_s4 = sld [smem:[#allocation48_spill]] (!%p2574_p1)  ;;  %s4894_s0 = sld [smem:[#allocation50_spill]] (!%p2574_p1) }
 0x178   : > { %v729_v58 = vld [vmem:[#allocation2 + $0x68] sm:$0xff]  ;;  %v3303_v5 = vld [vmem:[#allocation9] sm:$0xff] (!%p2574_p1)   ;;  %v3305_v7 = vld [vmem:[#allocation9 + $0x10] sm:$0xff] (!%p2574_p1)   ;;  %s4897_s3 = sld [smem:[#allocation52_spill]] (!%p2574_p1)  ;;  %s4898_s28 = sld [smem:[#allocation54_spill]] (!%p2574_p1) }
 0x179   : > { %2849 = vmatpush3.bf16.msra.mxu0 %v3297_v3  ;;  %3078 = vmatpush3.bf16.msra.mxu1 %v3297_v3  ;;  %v3304_v6 = vld [vmem:[#allocation9 + $0x8] sm:$0xff] (!%p2574_p1)   ;;  %v3306_v8 = vld [vmem:[#allocation9 + $0x18] sm:$0xff] (!%p2574_p1)   ;;  %v3309_v14 = vld [vmem:[#allocation9 + $0x30] sm:$0xff] (!%p2574_p1)  }
 0x17a   : > { %2850 = vmatprep.subr.bf16.mxu0 %v3298_v4  ;;  %3071 = vmatprep.subr.bf16.mxu1 %v3298_v4  ;;  %v3320_v13 = vld [vmem:[#allocation12 + $0x8] sm:$0xff] (!%p2574_p1)  }
 0x17d   : > { %2851 = vmatpush3.bf16.msra.mxu0 %v3298_v4  ;;  %3079 = vmatpush3.bf16.msra.mxu1 %v3298_v4 }
 0x17e   : > { %2852 = vmatprep.subr.bf16.mxu0 %v3299_v9  ;;  %3072 = vmatprep.subr.bf16.mxu1 %v3299_v9 }
 0x181   : > { %2853 = vmatpush3.bf16.msra.mxu0 %v3299_v9  ;;  %3080 = vmatpush3.bf16.msra.mxu1 %v3299_v9  ;;  %v3311_v9 = vld [vmem:[%s4298_s27] sm:$0xff] (!%p2574_p1)  }
 0x182   : > { %2854 = vmatprep.subr.bf16.mxu0 %v3300_v10  ;;  %3073 = vmatprep.subr.bf16.mxu1 %v3300_v10 }
 0x185   : > { %2855 = vmatpush3.bf16.msra.mxu0 %v3300_v10  ;;  %3081 = vmatpush3.bf16.msra.mxu1 %v3300_v10  ;;  %v3307_v10 = vld [vmem:[#allocation9 + $0x20] sm:$0xff] (!%p2574_p1)  }
 0x186   : > { %2856 = vmatprep.subr.bf16.mxu0 %v3301_v11  ;;  %3074 = vmatprep.subr.bf16.mxu1 %v3301_v11 }
 0x189   : > { %2857 = vmatpush3.bf16.msra.mxu0 %v3301_v11  ;;  %3082 = vmatpush3.bf16.msra.mxu1 %v3301_v11  ;;  %v3308_v11 = vld [vmem:[#allocation9 + $0x28] sm:$0xff] (!%p2574_p1)  }
 0x18a   : > { %2858 = vmatprep.subr.bf16.mxu0 %v3302_v12  ;;  %3075 = vmatprep.subr.bf16.mxu1 %v3302_v12 }
 0x18d   : > { %2859 = vmatpush3.bf16.msra.mxu0 %v3302_v12  ;;  %3083 = vmatpush3.bf16.msra.mxu1 %v3302_v12  ;;  %v3319_v12 = vld [vmem:[#allocation12] sm:$0xff] (!%p2574_p1)  }
 0x18e   : > { %2876 = vmatprep.subr.bf16.mxu0 (!%p2574_p1), %v3303_v5  ;;  %2908 = vmatprep.subr.bf16.mxu1 (!%p2574_p1), %v3319_v12 }
 0x190   : > { %2861 = vmatmul.mubr.bf16.vlgmr.msra.gmra.mrb[0].mxu0 %v709_v15  ;;  %2869 = vmatmul.mubr.bf16.vlgmr.msra.gmra.mrb[0].mxu1 %v713_v16  ;;  %v3321_v15 = vld [vmem:[#allocation12 + $0x10] sm:$0xff] (!%p2574_p1)   ;;  %v3310_v16 = vld [vmem:[#allocation9 + $0x38] sm:$0xff] (!%p2574_p1)  }
 0x191   : > { %2864 = vmatprep.mubr.bf16.mxu0 %v710_v17  ;;  %2872 = vmatprep.mubr.bf16.mxu1 %v714_v18  ;;  %v3322_v17 = vld [vmem:[#allocation12 + $0x18] sm:$0xff] (!%p2574_p1)   ;;  %v3323_v18 = vld [vmem:[#allocation12 + $0x20] sm:$0xff] (!%p2574_p1)  }
 0x192   : > { %2877 = vmatpush3.bf16.msra.mxu0 (!%p2574_p1), %v3303_v5  ;;  %2909 = vmatpush3.bf16.msra.mxu1 (!%p2574_p1), %v3319_v12  ;;  %v3332_v5 = vld [vmem:[#allocation11 + $0x28] sm:$0xff] (!%p2574_p1)  }
 0x193   : > { %2878 = vmatprep.subr.bf16.mxu0 (!%p2574_p1), %v3304_v6  ;;  %2910 = vmatprep.subr.bf16.mxu1 (!%p2574_p1), %v3320_v13 }
 0x196   : > { %2879 = vmatpush3.bf16.msra.mxu0 (!%p2574_p1), %v3304_v6  ;;  %2911 = vmatpush3.bf16.msra.mxu1 (!%p2574_p1), %v3320_v13 }
 0x197   : > { %2880 = vmatprep.subr.bf16.mxu0 (!%p2574_p1), %v3305_v7  ;;  %2912 = vmatprep.subr.bf16.mxu1 (!%p2574_p1), %v3321_v15 }
 0x198   : > { %2865 = vmatmul.mubr.bf16.gmra.mrb[4].mxu0 %v711_v19  ;;  %2873 = vmatmul.mubr.bf16.gmra.mrb[4].mxu1 %v715_v20  ;;  %v3312_v19 = vld [vmem:[%s4298_s27 + $0x8] sm:$0xff] (!%p2574_p1)   ;;  %v3313_v20 = vld [vmem:[%s4298_s27 + $0x10] sm:$0xff] (!%p2574_p1)  }
 0x199   : > { %2892 = vmatprep.mubr.bf16.mxu0 (!%p2574_p1), %v3311_v9  ;;  %v4403_v9 = vld [vmem:[%s4892_s8] ss:$0 sm:$0xff] (!%p2574_p1) }
 0x19a   : > { %2881 = vmatpush3.bf16.msra.mxu0 (!%p2574_p1), %v3305_v7  ;;  %2913 = vmatpush3.bf16.msra.mxu1 (!%p2574_p1), %v3321_v15 }
 0x19b   : > { %2882 = vmatprep.subr.bf16.mxu0 (!%p2574_p1), %v3306_v8  ;;  %2914 = vmatprep.subr.bf16.mxu1 (!%p2574_p1), %v3322_v17 }
 0x19e   : > { %2883 = vmatpush3.bf16.msra.mxu0 (!%p2574_p1), %v3306_v8  ;;  %2915 = vmatpush3.bf16.msra.mxu1 (!%p2574_p1), %v3322_v17  ;;  %v3333_v17 = vld [vmem:[#allocation11 + $0x30] sm:$0xff] (!%p2574_p1)  }
 0x19f   : > { %2884 = vmatprep.subr.bf16.mxu0 (!%p2574_p1), %v3307_v10  ;;  %2916 = vmatprep.subr.bf16.mxu1 (!%p2574_p1), %v3323_v18 }
 0x1a2   : > { %2885 = vmatpush3.bf16.msra.mxu0 (!%p2574_p1), %v3307_v10  ;;  %2917 = vmatpush3.bf16.msra.mxu1 (!%p2574_p1), %v3323_v18 }
 0x1a3   : > { %2886 = vmatprep.subr.bf16.mxu0 (!%p2574_p1), %v3308_v11 }
 0x1a6   : > { %2887 = vmatpush3.bf16.msra.mxu0 (!%p2574_p1), %v3308_v11 }
 0x1a7   : > { %2888 = vmatprep.subr.bf16.mxu0 (!%p2574_p1), %v3309_v14 }
 0x1aa   : > { %2889 = vmatpush3.bf16.msra.mxu0 (!%p2574_p1), %v3309_v14 }
 0x1ab   : > { %2890 = vmatprep.subr.bf16.mxu0 (!%p2574_p1), %v3310_v16 }
 0x1ae   : > { %2891 = vmatpush3.bf16.msra.mxu0 (!%p2574_p1), %v3310_v16 }
 0x263   : > { %v2862_v25 = vpop.f32.mrb[0].mxu0  ;;  %v2870_v26 = vpop.f32.mrb[0].mxu1 }
 0x264   : > { %v895_v29 = vadd.f32 %v2862_v25, %v718_v21  ;;  %v903_v30 = vadd.f32 %v2870_v26, %v726_v22  ;;  %v830_v31 = vpop.f32.mrb[1].mxu0  ;;  %v862_v32 = vpop.f32.mrb[1].mxu1  ;;  %v3324_v21 = vld [vmem:[#allocation12 + $0x28] sm:$0xff] (!%p2574_p1)   ;;  %v3314_v22 = vld [vmem:[%s4298_s27 + $0x18] sm:$0xff] (!%p2574_p1)   ;;  %v3317_v25 = vld [vmem:[%s4298_s27 + $0x30] sm:$0xff] (!%p2574_p1)  }
 0x265   : > { %v893_v35 = vadd.f32 %v830_v31, %v716_v23  ;;  %v901_v36 = vadd.f32 %v862_v32, %v724_v24  ;;  %v2863_v37 = vpop.f32.mrb[2].mxu0  ;;  %v2871_v38 = vpop.f32.mrb[2].mxu1  ;;  %2918 = vmatprep.subr.bf16.mxu1 (!%p2574_p1), %v3324_v21  ;;  %v3315_v23 = vld [vmem:[%s4298_s27 + $0x20] sm:$0xff] (!%p2574_p1)   ;;  %v3316_v24 = vld [vmem:[%s4298_s27 + $0x28] sm:$0xff] (!%p2574_p1)   ;;  %v3318_v26 = vld [vmem:[%s4298_s27 + $0x38] sm:$0xff] (!%p2574_p1)   ;;  %s4895_s27 = sld [smem:[#allocation51_spill]] (!%p2574_p1) }
 0x266   : > { %911 = vst [vmem:[#allocation2 + $0x10] sm:$0xff] %v895_v29  ;;  %919 = vst [vmem:[#allocation2 + $0x50] sm:$0xff] %v903_v30  ;;  %v896_v39 = vadd.f32 %v2863_v37, %v719_v27  ;;  %v904_v40 = vadd.f32 %v2871_v38, %v727_v28  ;;  %v833_v41 = vpop.f32.mrb[3].mxu0  ;;  %v865_v42 = vpop.f32.mrb[3].mxu1  ;;  %2893 = vmatmul.mubr.bf16.vlgmr.msra.gmra.mrb[0].mxu0 (!%p2574_p1), %v3312_v19  ;;  %2919 = vmatpush3.bf16.msra.mxu1 (!%p2574_p1), %v3324_v21  ;;  %v3325_v27 = vld [vmem:[#allocation12 + $0x30] sm:$0xff] (!%p2574_p1)   ;;  %v3326_v28 = vld [vmem:[#allocation12 + $0x38] sm:$0xff] (!%p2574_p1)  }
 0x267   : > { %909 = vst [vmem:[#allocation2] sm:$0xff] %v893_v35  ;;  %917 = vst [vmem:[#allocation2 + $0x40] sm:$0xff] %v901_v36  ;;  %v894_v43 = vadd.f32 %v833_v41, %v717_v33  ;;  %v902_v44 = vadd.f32 %v865_v42, %v725_v34  ;;  %2896 = vmatprep.mubr.bf16.mxu0 (!%p2574_p1), %v3313_v20  ;;  %2920 = vmatprep.subr.bf16.mxu1 (!%p2574_p1), %v3325_v27  ;;  %v3327_v29 = vld [vmem:[#allocation11] sm:$0xff] (!%p2574_p1)   ;;  %v3336_v31 = vld [vmem:[#allocation14 + $0x8] sm:$0xff] (!%p2574_p1)  }
 0x268   : > { %912 = vst [vmem:[#allocation2 + $0x18] sm:$0xff] %v896_v39  ;;  %920 = vst [vmem:[#allocation2 + $0x58] sm:$0xff] %v904_v40  ;;  %v3335_v30 = vld [vmem:[#allocation14] sm:$0xff] (!%p2574_p1)   ;;  %v3337_v32 = vld [vmem:[#allocation14 + $0x10] sm:$0xff] (!%p2574_p1)  }
 0x269   : > { %910 = vst [vmem:[#allocation2 + $0x8] sm:$0xff] %v894_v43  ;;  %918 = vst [vmem:[#allocation2 + $0x48] sm:$0xff] %v902_v44  ;;  %2972 = vmatprep.subr.bf16.mxu0 (!%p2574_p1), %v3335_v30  ;;  %v3338_v33 = vld [vmem:[#allocation14 + $0x18] sm:$0xff] (!%p2574_p1)   ;;  %v3339_v34 = vld [vmem:[#allocation14 + $0x20] sm:$0xff] (!%p2574_p1)  }
 0x26a   : > { %2921 = vmatpush3.bf16.msra.mxu1 (!%p2574_p1), %v3325_v27  ;;  %2973 = vmatpush3.bf16.msra.mxu0 (!%p2574_p1), %v3335_v30  ;;  %v4350_v36 = vld [vmem:[%s4891_s11] ss:$0 sm:$0xff] (!%p2574_p1) }
 0x26b   : > { %v2866_v49 = vpop.f32.mrb[4].mxu0  ;;  %v2874_v50 = vpop.f32.mrb[4].mxu1  ;;  %928 = sbr.rel (%p2574_p1) target bundleno = 1788 (0x6fc), region = 120  ;;  %2922 = vmatprep.subr.bf16.mxu1 (!%p2574_p1), %v3326_v28  ;;  %2974 = vmatprep.subr.bf16.mxu0 (!%p2574_p1), %v3336_v31  ;;  %s4896_s15 = smov (!%p2574_p1), %s4895_s27 }
 0x26c   : > { %v899_v53 = vadd.f32 %v2866_v49, %v722_v45  ;;  %v907_v54 = vadd.f32 %v2874_v50, %v730_v46  ;;  %v846_v55 = vpop.f32.mrb[5].mxu0  ;;  %v878_v56 = vpop.f32.mrb[5].mxu1  ;;  %v3328_v46 = vld [vmem:[#allocation11 + $0x8] sm:$0xff] (!%p2574_p1)  }
 0x26d   : > { %v897_v59 = vadd.f32 %v846_v55, %v720_v47  ;;  %v905_v60 = vadd.f32 %v878_v56, %v728_v48  ;;  %v2867_v61 = vpop.f32.mrb[6].mxu0  ;;  %v2875_v62 = vpop.f32.mrb[6].mxu1 }
 0x26e   : > { %915 = vst [vmem:[#allocation2 + $0x30] sm:$0xff] %v899_v53  ;;  %923 = vst [vmem:[#allocation2 + $0x70] sm:$0xff] %v907_v54  ;;  %v900_v63 = vadd.f32 %v2867_v61, %v723_v51  ;;  %v908_v0 = vadd.f32 %v2875_v62, %v731_v52  ;;  %v849_v1 = vpop.f32.mrb[7].mxu0  ;;  %v881_v2 = vpop.f32.mrb[7].mxu1  ;;  %2897 = vmatmul.mubr.bf16.gmra.mrb[4].mxu0 (!%p2574_p1), %v3314_v22  ;;  %2923 = vmatpush3.bf16.msra.mxu1 (!%p2574_p1), %v3326_v28  ;;  %v3329_v52 = vld [vmem:[#allocation11 + $0x10] sm:$0xff] (!%p2574_p1)   ;;  %v929_v7 = vld [vmem:[#allocation2] sm:$0xff] (!%p2574_p1) }
 0x26f   : > { %913 = vst [vmem:[#allocation2 + $0x20] sm:$0xff] %v897_v59  ;;  %921 = vst [vmem:[#allocation2 + $0x60] sm:$0xff] %v905_v60  ;;  %v898_v3 = vadd.f32 %v849_v1, %v721_v57  ;;  %v906_v4 = vadd.f32 %v881_v2, %v729_v58  ;;  %2900 = vmatprep.mubr.bf16.mxu0 (!%p2574_p1), %v3315_v23  ;;  %2940 = vmatprep.subr.bf16.mxu1 (!%p2574_p1), %v3327_v29  ;;  %v3330_v58 = vld [vmem:[#allocation11 + $0x18] sm:$0xff] (!%p2574_p1)   ;;  %v931_v23 = vld [vmem:[#allocation2 + $0x10] sm:$0xff] (!%p2574_p1) }
 0x270   : > { %916 = vst [vmem:[#allocation2 + $0x38] sm:$0xff] %v900_v63  ;;  %924 = vst [vmem:[#allocation2 + $0x78] sm:$0xff] %v908_v0  ;;  %2975 = vmatpush3.bf16.msra.mxu0 (!%p2574_p1), %v3336_v31  ;;  %v3331_v0 = vld [vmem:[#allocation11 + $0x20] sm:$0xff] (!%p2574_p1)   ;;  %v930_v8 = vld [vmem:[#allocation2 + $0x8] sm:$0xff] (!%p2574_p1)  ;;  %v4406_v13 = vadd.f32 (!%p2574_p1), %v4403_v9, %v929_v7 }
 0x271   : > { %914 = vst [vmem:[#allocation2 + $0x28] sm:$0xff] %v898_v3  ;;  %922 = vst [vmem:[#allocation2 + $0x68] sm:$0xff] %v906_v4  ;;  %2976 = vmatprep.subr.bf16.mxu0 (!%p2574_p1), %v3337_v32  ;;  %v4409_v14 = vadd.f32 (!%p2574_p1), %v4403_v9, %v930_v8  ;;  %v3340_v8 = vld [vmem:[#allocation14 + $0x28] sm:$0xff] (!%p2574_p1)  }
 0x273   : > { %v1200_v22 = vpack.c.bf16 %v4409_v14, %v4406_v13 }
 0x274   : > { %2977 = vmatpush3.bf16.msra.mxu0 %v3337_v32 }
 0x275   : > { %2978 = vmatprep.subr.bf16.mxu0 %v3338_v33 }
 0x276   : > { %2901 = vmatmul.mubr.bf16.gmra.mrb[8].mxu0 %v3316_v24  ;;  %v932_v24 = vld [vmem:[#allocation2 + $0x18] sm:$0xff]  ;;  %v933_v27 = vld [vmem:[#allocation2 + $0x20] sm:$0xff] }
 0x277   : > { %2904 = vmatprep.mubr.bf16.mxu0 %v3317_v25  ;;  %v4431_v30 = vadd.f32 %v4403_v9, %v932_v24  ;;  %v4434_v31 = vadd.f32 %v4403_v9, %v933_v27 }
 0x278   : > { %2979 = vmatpush3.bf16.msra.mxu0 %v3338_v33  ;;  %v934_v28 = vld [vmem:[#allocation2 + $0x28] sm:$0xff] }
 0x279   : > { %2980 = vmatprep.subr.bf16.mxu0 %v3339_v34  ;;  %v4437_v32 = vadd.f32 %v4403_v9, %v934_v28 }
 0x27c   : > { %2981 = vmatpush3.bf16.msra.mxu0 %v3339_v34  ;;  %v1202_v34 = vpack.c.bf16 %v4437_v32, %v4434_v31 }
 0x27d   : > { %2982 = vmatprep.subr.bf16.mxu0 %v3340_v8 }
 0x27e   : > { %2905 = vmatmul.mubr.bf16.gmra.mrb[12].mxu0 %v3318_v26  ;;  %v3334_v26 = vld [vmem:[#allocation11 + $0x38] sm:$0xff]  }
 0x280   : > { %2983 = vmatpush3.bf16.msra.mxu0 %v3340_v8 }
 0x339   : > { %v2894_v35 = vpop.f32.mrb[0].mxu0 }
 0x33a   : > { %v1137_v37 = vpop.f32.mrb[1].mxu0  ;;  %v4362_v43 = vadd.f32 %v2894_v35, %v4350_v36  ;;  %v935_v35 = vld [vmem:[#allocation2 + $0x30] sm:$0xff] }
 0x33b   : > { %v2895_v38 = vpop.f32.mrb[2].mxu0  ;;  %v4356_v41 = vadd.f32 %v4350_v36, %v1137_v37  ;;  %v937_v37 = vld [vmem:[#allocation2 + $0x40] sm:$0xff] }
 0x33c   : > { %v4353_v39 = vadd.f32 %v2895_v38, %v4350_v36  ;;  %v1140_v40 = vpop.f32.mrb[3].mxu0  ;;  %v938_v38 = vld [vmem:[#allocation2 + $0x48] sm:$0xff] }
 0x33d   : > { %v4359_v42 = vadd.f32 %v4350_v36, %v1140_v40  ;;  %v4443_v40 = vadd.f32 %v4403_v9, %v935_v35 }
 0x33e   : > { %v1209_v45 = vpack.c.bf16 %v4353_v39, %v4362_v43 }
 0x33f   : > { %v1208_v44 = vpack.c.bf16 %v4359_v42, %v4356_v41 }
 0x341   : > { %v2898_v47 = vpop.f32.mrb[4].mxu0  ;;  %2924 = vmatprep.mubr.bf16.mxu1 %v1208_v44 }
 0x342   : > { %v1153_v48 = vpop.f32.mrb[5].mxu0  ;;  %2925 = vmatmul.mubr.bf16.vlgmr.msra.gmra.mrb[0].mxu1 %v1209_v45  ;;  %v4378_v55 = vadd.f32 %v2898_v47, %v4350_v36  ;;  %v4449_v45 = vadd.f32 %v4403_v9, %v937_v37 }
 0x343   : > { %2941 = vmatpush3.bf16.msra.mxu1 %v3327_v29  ;;  %v2899_v49 = vpop.f32.mrb[6].mxu0  ;;  %v4372_v53 = vadd.f32 %v4350_v36, %v1153_v48  ;;  %v954_v29 = vadd.f32 %v4403_v9, %v931_v23 }
 0x344   : > { %v4369_v50 = vadd.f32 %v2899_v49, %v4350_v36  ;;  %v1156_v51 = vpop.f32.mrb[7].mxu0  ;;  %2942 = vmatprep.subr.bf16.mxu1 %v3328_v46  ;;  %v939_v49 = vld [vmem:[#allocation2 + $0x50] sm:$0xff] }
 0x345   : > { %v4375_v54 = vadd.f32 %v4350_v36, %v1156_v51  ;;  %v1201_v33 = vpack.c.bf16 %v4431_v30, %v954_v29  ;;  %v940_v51 = vld [vmem:[#allocation2 + $0x58] sm:$0xff] }
 0x346   : > { %v1211_v57 = vpack.c.bf16 %v4369_v50, %v4378_v55 }
 0x347   : > { %v1210_v56 = vpack.c.bf16 %v4375_v54, %v4372_v53  ;;  %2943 = vmatpush3.bf16.msra.mxu1 %v3328_v46  ;;  %v4452_v46 = vadd.f32 %v4403_v9, %v938_v38 }
 0x348   : > { %2944 = vmatprep.subr.bf16.mxu1 %v3329_v52 }
 0x349   : > { %v2902_v59 = vpop.f32.mrb[8].mxu0  ;;  %2928 = vmatprep.mubr.bf16.mxu1 %v1210_v56  ;;  %v1204_v48 = vpack.c.bf16 %v4452_v46, %v4449_v45  ;;  %v942_v56 = vld [vmem:[#allocation2 + $0x68] sm:$0xff] }
 0x34a   : > { %v1169_v60 = vpop.f32.mrb[9].mxu0  ;;  %2929 = vmatmul.mubr.bf16.gmra.mrb[4].mxu1 %v1211_v57  ;;  %v4394_v3 = vadd.f32 %v2902_v59, %v4350_v36  ;;  %v4459_v57 = vadd.f32 %v4403_v9, %v939_v49 }
 0x34b   : > { %2945 = vmatpush3.bf16.msra.mxu1 %v3329_v52  ;;  %v2903_v61 = vpop.f32.mrb[10].mxu0  ;;  %v4388_v1 = vadd.f32 %v4350_v36, %v1169_v60  ;;  %v941_v52 = vld [vmem:[#allocation2 + $0x60] sm:$0xff]  ;;  %v4468_v60 = vadd.f32 %v4403_v9, %v942_v56 }
 0x34c   : > { %v4385_v62 = vadd.f32 %v2903_v61, %v4350_v36  ;;  %v1172_v63 = vpop.f32.mrb[11].mxu0  ;;  %2946 = vmatprep.subr.bf16.mxu1 %v3330_v58  ;;  %v4465_v59 = vadd.f32 %v4403_v9, %v941_v52 }
 0x34d   : > { %v4391_v2 = vadd.f32 %v4350_v36, %v1172_v63 }
 0x34e   : > { %v1213_v6 = vpack.c.bf16 %v4385_v62, %v4394_v3  ;;  %v1206_v63 = vpack.c.bf16 %v4468_v60, %v4465_v59 }
 0x34f   : > { %v1212_v4 = vpack.c.bf16 %v4391_v2, %v4388_v1  ;;  %2947 = vmatpush3.bf16.msra.mxu1 %v3330_v58  ;;  %v4462_v58 = vadd.f32 %v4403_v9, %v940_v51 }
 0x350   : > { %2948 = vmatprep.subr.bf16.mxu1 %v3331_v0 }
 0x351   : > { %v2906_v10 = vpop.f32.mrb[12].mxu0  ;;  %2932 = vmatprep.mubr.bf16.mxu1 %v1212_v4  ;;  %v1205_v61 = vpack.c.bf16 %v4462_v58, %v4459_v57  ;;  %v944_v4 = vld [vmem:[#allocation2 + $0x78] sm:$0xff] }
 0x352   : > { %v1185_v11 = vpop.f32.mrb[13].mxu0  ;;  %2933 = vmatmul.mubr.bf16.gmra.mrb[8].mxu1 %v1213_v6  ;;  %v4421_v20 = vadd.f32 %v2906_v10, %v4350_v36  ;;  %v4478_v6 = vadd.f32 %v4403_v9, %v944_v4  ;;  %v3341_v10 = vld [vmem:[#allocation14 + $0x30] sm:$0xff]  }
 0x353   : > { %2949 = vmatpush3.bf16.msra.mxu1 %v3331_v0  ;;  %v2907_v12 = vpop.f32.mrb[14].mxu0  ;;  %v4415_v18 = vadd.f32 %v4350_v36, %v1185_v11  ;;  %v943_v0 = vld [vmem:[#allocation2 + $0x70] sm:$0xff]  ;;  %2984 = vmatprep.subr.bf16.mxu0 %v3341_v10  ;;  %v3342_v11 = vld [vmem:[#allocation14 + $0x38] sm:$0xff]  }
 0x354   : > { %v4412_v15 = vadd.f32 %v2907_v12, %v4350_v36  ;;  %v1188_v16 = vpop.f32.mrb[15].mxu0  ;;  %2950 = vmatprep.subr.bf16.mxu1 %v3332_v5  ;;  %2985 = vmatpush3.bf16.msra.mxu0 %v3341_v10  ;;  %v3343_v12 = vld [vmem:[#allocation14 + $0x40] sm:$0xff]  }
 0x355   : > { %v4418_v19 = vadd.f32 %v4350_v36, %v1188_v16  ;;  %v936_v36 = vld [vmem:[#allocation2 + $0x38] sm:$0xff]  ;;  %2986 = vmatprep.subr.bf16.mxu0 %v3342_v11 }
 0x356   : > { %v1215_v25 = vpack.c.bf16 %v4412_v15, %v4421_v20  ;;  %v4446_v44 = vadd.f32 %v4403_v9, %v936_v36 }
 0x357   : > { %v1214_v21 = vpack.c.bf16 %v4418_v19, %v4415_v18  ;;  %2951 = vmatpush3.bf16.msra.mxu1 %v3332_v5  ;;  %v4475_v5 = vadd.f32 %v4403_v9, %v943_v0  ;;  %v4485_v9 = vld [vmem:[%s4893_s4] ss:$0 sm:$0xff] }
 0x358   : > { %2952 = vmatprep.subr.bf16.mxu1 %v3333_v17  ;;  %v1203_v47 = vpack.c.bf16 %v4446_v44, %v4443_v40  ;;  %2987 = vmatpush3.bf16.msra.mxu0 %v3342_v11 }
 0x359   : > { %2936 = vmatprep.mubr.bf16.mxu1 %v1214_v21  ;;  %v1207_v7 = vpack.c.bf16 %v4478_v6, %v4475_v5  ;;  %3004 = vmatprep.subr.bf16.mxu0 %v3343_v12 }
 0x35a   : > { %2937 = vmatmul.mubr.bf16.gmra.mrb[12].mxu1 %v1215_v25 }
 0x35b   : > { %2953 = vmatpush3.bf16.msra.mxu1 %v3333_v17  ;;  %2956 = vmatprep.mubr.bf16.mxu1 %v1200_v22 }
 0x35c   : > { %2954 = vmatprep.subr.bf16.mxu1 %v3334_v26 }
 0x35f   : > { %2955 = vmatpush3.bf16.msra.mxu1 %v3334_v26 }
 0x362   : > { %2957 = vmatmul.mubr.bf16.vlgmr.msra.gmra.mrb[0].mxu1 %v1201_v33 }
 0x363   : > { %2960 = vmatprep.mubr.bf16.mxu1 %v1202_v34 }
 0x36a   : > { %2961 = vmatmul.mubr.bf16.gmra.mrb[4].mxu1 %v1203_v47 }
 0x36b   : > { %2964 = vmatprep.mubr.bf16.mxu1 %v1204_v48 }
 0x372   : > { %2965 = vmatmul.mubr.bf16.gmra.mrb[8].mxu1 %v1205_v61 }
 0x373   : > { %2968 = vmatprep.mubr.bf16.mxu1 %v1206_v63 }
 0x37a   : > { %2969 = vmatmul.mubr.bf16.gmra.mrb[12].mxu1 %v1207_v7  ;;  %v3344_v7 = vld [vmem:[#allocation14 + $0x48] sm:$0xff]  }
 0x435   : > { %v2958_v16 = vpop.f32.mrb[0].mxu1 }
 0x436   : > { %v1547_v17 = vadd.f32 %v2958_v16, %v4485_v9  ;;  %v1475_v21 = vpop.f32.mrb[1].mxu1 }
 0x437   : > { %v1545_v22 = vadd.f32 %v4485_v9, %v1475_v21  ;;  %v2959_v23 = vpop.f32.mrb[2].mxu1 }
 0x438   : > { %v1563_v24 = vadd.f32 %v1547_v17, %v954_v29  ;;  %v1548_v25 = vadd.f32 %v2959_v23, %v4485_v9  ;;  %v1478_v26 = vpop.f32.mrb[3].mxu1 }
 0x439   : > { %v1561_v27 = vadd.f32 %v1545_v22, %v4406_v13  ;;  %v1546_v28 = vadd.f32 %v4485_v9, %v1478_v26 }
 0x43a   : > { %v1579_v33 = vadd.f32 %v1563_v24, %v4362_v43  ;;  %v1564_v34 = vadd.f32 %v1548_v25, %v4431_v30 }
 0x43b   : > { %v1577_v35 = vadd.f32 %v1561_v27, %v4356_v41  ;;  %v1562_v36 = vadd.f32 %v1546_v28, %v4409_v14 }
 0x43c   : > { %v1580_v37 = vadd.f32 %v1564_v34, %v4353_v39  ;;  %v1595_v47 = vmax.f32 %v1579_v33, 0.0  ;;  %v3346_v34 = vld [vmem:[#allocation14 + $0x58] sm:$0xff]  }
 0x43d   : > { %v1578_v38 = vadd.f32 %v1562_v36, %v4359_v42  ;;  %v2962_v29 = vpop.f32.mrb[4].mxu1  ;;  %v1593_v51 = vmax.f32 %v1577_v35, 0.0 }
 0x43e   : > { %v1596_v48 = vmax.f32 %v1580_v37, 0.0  ;;  %v1551_v49 = vadd.f32 %v2962_v29, %v4485_v9  ;;  %v1491_v13 = vpop.f32.mrb[5].mxu1 }
 0x43f   : > { %v1594_v52 = vmax.f32 %v1578_v38, 0.0  ;;  %v1549_v43 = vadd.f32 %v4485_v9, %v1491_v13  ;;  %v2963_v56 = vpop.f32.mrb[6].mxu1 }
 0x440   : > { %v1610_v30 = vpack.c.bf16 %v1596_v48, %v1595_v47  ;;  %v1567_v41 = vadd.f32 %v1551_v49, %v4443_v40  ;;  %v1552_v14 = vadd.f32 %v2963_v56, %v4485_v9  ;;  %v1494_v61 = vpop.f32.mrb[7].mxu1 }
 0x441   : > { %v1565_v39 = vadd.f32 %v1549_v43, %v4434_v31  ;;  %v1550_v42 = vadd.f32 %v4485_v9, %v1494_v61  ;;  %v1609_v63 = vpack.c.bf16 %v1594_v52, %v1593_v51 }
 0x442   : > { %v1583_v0 = vadd.f32 %v1567_v41, %v4378_v55  ;;  %v1568_v4 = vadd.f32 %v1552_v14, %v4446_v44  ;;  %v3345_v44 = vld [vmem:[#allocation14 + $0x50] sm:$0xff]  }
 0x443   : > { %v1581_v8 = vadd.f32 %v1565_v39, %v4372_v53  ;;  %v1566_v10 = vadd.f32 %v1550_v42, %v4437_v32  ;;  %2988 = vmatprep.mubr.bf16.mxu0 %v1609_v63 }
 0x444   : > { %v1584_v40 = vadd.f32 %v1568_v4, %v4369_v50  ;;  %2989 = vmatmul.mubr.bf16.vlgmr.msra.gmra.mrb[16].mxu0 %v1610_v30  ;;  %v1599_v31 = vmax.f32 %v1583_v0, 0.0  ;;  %v3353_v4 = vld [vmem:[#allocation15 + $0x10] sm:$0xff]  }
 0x445   : > { %v1582_v11 = vadd.f32 %v1566_v10, %v4375_v54  ;;  %v2966_v16 = vpop.f32.mrb[8].mxu1  ;;  %3005 = vmatpush3.bf16.msra.mxu0 %v3343_v12  ;;  %v1597_v22 = vmax.f32 %v1581_v8, 0.0  ;;  %v3355_v8 = vld [vmem:[#allocation15 + $0x20] sm:$0xff]  }
 0x446   : > { %v1600_v17 = vmax.f32 %v1584_v40, 0.0  ;;  %v1555_v21 = vadd.f32 %v2966_v16, %v4485_v9  ;;  %v1507_v55 = vpop.f32.mrb[9].mxu1  ;;  %3006 = vmatprep.subr.bf16.mxu0 %v3344_v7  ;;  %v4537_v10 = vld [vmem:[%s4894_s0] ss:$0 sm:$0xff] }
 0x447   : > { %v1598_v23 = vmax.f32 %v1582_v11, 0.0  ;;  %v1553_v53 = vadd.f32 %v4485_v9, %v1507_v55  ;;  %v2967_v32 = vpop.f32.mrb[10].mxu1 }
 0x448   : > { %v1571_v24 = vadd.f32 %v1555_v21, %v4459_v57  ;;  %v1556_v50 = vadd.f32 %v2967_v32, %v4485_v9  ;;  %v1510_v25 = vpop.f32.mrb[11].mxu1  ;;  %v1612_v54 = vpack.c.bf16 %v1600_v17, %v1599_v31  ;;  %v4543_v31 = vld [vmem:[%s4895_s27] ss:$0 sm:$0xff] }
 0x449   : > { %v1569_v12 = vadd.f32 %v1553_v53, %v4449_v45  ;;  %v1554_v26 = vadd.f32 %v4485_v9, %v1510_v25  ;;  %v1611_v27 = vpack.c.bf16 %v1598_v23, %v1597_v22  ;;  %3007 = vmatpush3.bf16.msra.mxu0 %v3344_v7  ;;  %v3354_v7 = vld [vmem:[#allocation15 + $0x18] sm:$0xff]  }
 0x44a   : > { %v1587_v28 = vadd.f32 %v1571_v24, %v4394_v3  ;;  %v1572_v33 = vadd.f32 %v1556_v50, %v4462_v58  ;;  %3008 = vmatprep.subr.bf16.mxu0 %v3345_v44  ;;  %v3347_v58 = vld [vmem:[#allocation14 + $0x60] sm:$0xff]  }
 0x44b   : > { %v1585_v35 = vadd.f32 %v1569_v12, %v4388_v1  ;;  %v1570_v57 = vadd.f32 %v1554_v26, %v4452_v46  ;;  %2992 = vmatprep.mubr.bf16.mxu0 %v1611_v27  ;;  %v4552_v50 = vld [vmem:[%s4897_s3] ss:$0 sm:$0xff] }
 0x44c   : > { %v1588_v36 = vadd.f32 %v1572_v33, %v4385_v62  ;;  %2993 = vmatmul.mubr.bf16.gmra.mrb[20].mxu0 %v1612_v54  ;;  %v1603_v38 = vmax.f32 %v1587_v28, 0.0 }
 0x44d   : > { %v1586_v45 = vadd.f32 %v1570_v57, %v4391_v2  ;;  %v2970_v37 = vpop.f32.mrb[12].mxu1  ;;  %3009 = vmatpush3.bf16.msra.mxu0 %v3345_v44  ;;  %v1601_v48 = vmax.f32 %v1585_v35, 0.0 }
 0x44e   : > { %v1604_v29 = vmax.f32 %v1588_v36, 0.0  ;;  %v1559_v3 = vadd.f32 %v2970_v37, %v4485_v9  ;;  %v1523_v47 = vpop.f32.mrb[13].mxu1  ;;  %3010 = vmatprep.subr.bf16.mxu0 %v3346_v34 }
 0x44f   : > { %v1602_v49 = vmax.f32 %v1586_v45, 0.0  ;;  %v1557_v1 = vadd.f32 %v4485_v9, %v1523_v47  ;;  %v2971_v46 = vpop.f32.mrb[14].mxu1 }
 0x450   : > { %v1575_v13 = vadd.f32 %v1559_v3, %v4475_v5  ;;  %v1560_v62 = vadd.f32 %v2971_v46, %v4485_v9  ;;  %v1526_v51 = vpop.f32.mrb[15].mxu1  ;;  %v1614_v2 = vpack.c.bf16 %v1604_v29, %v1603_v38 }
 0x451   : > { %v1573_v52 = vadd.f32 %v1557_v1, %v4465_v59  ;;  %v1558_v43 = vadd.f32 %v4485_v9, %v1526_v51  ;;  %v1613_v56 = vpack.c.bf16 %v1602_v49, %v1601_v48  ;;  %3011 = vmatpush3.bf16.msra.mxu0 %v3346_v34 }
 0x452   : > { %v1591_v30 = vadd.f32 %v1575_v13, %v4421_v20  ;;  %v1576_v41 = vadd.f32 %v1560_v62, %v4478_v6  ;;  %3012 = vmatprep.subr.bf16.mxu0 %v3347_v58  ;;  %v3348_v6 = vld [vmem:[#allocation14 + $0x68] sm:$0xff]  }
 0x453   : > { %v1589_v14 = vadd.f32 %v1573_v52, %v4415_v18  ;;  %v1574_v61 = vadd.f32 %v1558_v43, %v4468_v60  ;;  %2996 = vmatprep.mubr.bf16.mxu0 %v1613_v56  ;;  %v3349_v18 = vld [vmem:[#allocation14 + $0x70] sm:$0xff]   ;;  %v3350_v60 = vld [vmem:[#allocation14 + $0x78] sm:$0xff]  }
 0x454   : > { %v1592_v5 = vadd.f32 %v1576_v41, %v4412_v15  ;;  %2997 = vmatmul.mubr.bf16.gmra.mrb[24].mxu0 %v1614_v2  ;;  %v1607_v59 = vmax.f32 %v1591_v30, 0.0  ;;  %v3351_v15 = vld [vmem:[#allocation15] sm:$0xff]  }
 0x455   : > { %v1590_v39 = vadd.f32 %v1574_v61, %v4418_v19  ;;  %3013 = vmatpush3.bf16.msra.mxu0 %v3347_v58  ;;  %v1605_v42 = vmax.f32 %v1589_v14, 0.0  ;;  %v3352_v19 = vld [vmem:[#allocation15 + $0x8] sm:$0xff]   ;;  %3036 = vmatprep.subr.bf16.mxu1 %v3351_v15 }
 0x456   : > { %v1608_v9 = vmax.f32 %v1592_v5, 0.0  ;;  %3014 = vmatprep.subr.bf16.mxu0 %v3348_v6  ;;  %3037 = vmatpush3.bf16.msra.mxu1 %v3351_v15 }
 0x457   : > { %v1606_v63 = vmax.f32 %v1590_v39, 0.0  ;;  %3038 = vmatprep.subr.bf16.mxu1 %v3352_v19 }
 0x458   : > { %v1616_v0 = vpack.c.bf16 %v1608_v9, %v1607_v59 }
 0x459   : > { %v1615_v20 = vpack.c.bf16 %v1606_v63, %v1605_v42  ;;  %3015 = vmatpush3.bf16.msra.mxu0 %v3348_v6 }
 0x45a   : > { %3016 = vmatprep.subr.bf16.mxu0 %v3349_v18  ;;  %3039 = vmatpush3.bf16.msra.mxu1 %v3352_v19 }
 0x45b   : > { %3000 = vmatprep.mubr.bf16.mxu0 %v1615_v20  ;;  %3040 = vmatprep.subr.bf16.mxu1 %v3353_v4 }
 0x45c   : > { %3001 = vmatmul.mubr.bf16.gmra.mrb[28].mxu0 %v1616_v0 }
 0x45d   : > { %3017 = vmatpush3.bf16.msra.mxu0 %v3349_v18 }
 0x45e   : > { %3018 = vmatprep.subr.bf16.mxu0 %v3350_v60  ;;  %3041 = vmatpush3.bf16.msra.mxu1 %v3353_v4 }
 0x45f   : > { %3042 = vmatprep.subr.bf16.mxu1 %v3354_v7 }
 0x461   : > { %3019 = vmatpush3.bf16.msra.mxu0 %v3350_v60 }
 0x462   : > { %3043 = vmatpush3.bf16.msra.mxu1 %v3354_v7 }
 0x463   : > { %3044 = vmatprep.subr.bf16.mxu1 %v3355_v8 }
 0x466   : > { %3045 = vmatpush3.bf16.msra.mxu1 %v3355_v8 }
 0x517   : > { %v2990_v40 = vpop.f32.mrb[16].mxu0 }
 0x518   : > { %v1731_v11 = vadd.f32 %v2990_v40, %v4537_v10  ;;  %v1722_v16 = vpop.f32.mrb[17].mxu0 }
 0x519   : > { %v1723_v17 = vadd.f32 %v4537_v10, %v1722_v16  ;;  %v2991_v21 = vpop.f32.mrb[18].mxu0 }
 0x51a   : > { %v1787_v55 = vmax.f32 %v1731_v11, 0.0  ;;  %v1734_v44 = vadd.f32 %v2991_v21, %v4537_v10  ;;  %v1725_v22 = vpop.f32.mrb[19].mxu0 }
 0x51b   : > { %v1785_v23 = vmax.f32 %v1723_v17, 0.0  ;;  %v1726_v53 = vadd.f32 %v4537_v10, %v1725_v22 }
 0x51c   : > { %v1810_v32 = vmul.f32 %v4543_v31, %v1787_v55  ;;  %v1788_v24 = vmax.f32 %v1734_v44, 0.0 }
 0x51d   : > { %v1808_v25 = vmul.f32 %v4543_v31, %v1785_v23  ;;  %v1786_v54 = vmax.f32 %v1726_v53, 0.0 }
 0x51e   : > { %v1811_v12 = vmul.f32 %v4543_v31, %v1788_v24  ;;  %v1833_v28 = vadd.f32 %v4552_v50, %v1810_v32 }
 0x51f   : > { %v1809_v26 = vmul.f32 %v4543_v31, %v1786_v54  ;;  %v2994_v27 = vpop.f32.mrb[20].mxu0  ;;  %v1831_v57 = vadd.f32 %v4552_v50, %v1808_v25 }
 0x520   : > { %v1834_v33 = vadd.f32 %v4552_v50, %v1811_v12  ;;  %v1747_v34 = vadd.f32 %v2994_v27, %v4537_v10  ;;  %v1738_v35 = vpop.f32.mrb[21].mxu0 }
 0x521   : > { %v1832_v36 = vadd.f32 %v4552_v50, %v1809_v26  ;;  %v1739_v45 = vadd.f32 %v4537_v10, %v1738_v35  ;;  %v2995_v37 = vpop.f32.mrb[22].mxu0 }
 0x522   : > { %v1848_v38 = vpack.c.bf16 %v1834_v33, %v1833_v28  ;;  %v1791_v29 = vmax.f32 %v1747_v34, 0.0  ;;  %v1750_v3 = vadd.f32 %v2995_v37, %v4537_v10  ;;  %v1741_v47 = vpop.f32.mrb[23].mxu0 }
 0x523   : > { %v1789_v58 = vmax.f32 %v1739_v45, 0.0  ;;  %v1742_v48 = vadd.f32 %v4537_v10, %v1741_v47  ;;  %v1847_v49 = vpack.c.bf16 %v1832_v36, %v1831_v57  ;;  %v3358_v47 = vld [vmem:[#allocation15 + $0x38] sm:$0xff]  }
 0x524   : > { %v1814_v1 = vmul.f32 %v4543_v31, %v1791_v29  ;;  %v1792_v46 = vmax.f32 %v1750_v3, 0.0  ;;  %v3356_v29 = vld [vmem:[#allocation15 + $0x28] sm:$0xff]   ;;  %v3357_v3 = vld [vmem:[#allocation15 + $0x30] sm:$0xff]  }
 0x525   : > { %v1812_v13 = vmul.f32 %v4543_v31, %v1789_v58  ;;  %v1790_v62 = vmax.f32 %v1742_v48, 0.0  ;;  %3020 = vmatprep.mubr.bf16.mxu0 %v1847_v49  ;;  %3046 = vmatprep.subr.bf16.mxu1 %v3356_v29  ;;  %v4606_v49 = vld [vmem:[%s4896_s15 + $0x1] ss:$0 sm:$0xff] }
 0x526   : > { %v1815_v51 = vmul.f32 %v4543_v31, %v1792_v46  ;;  %3021 = vmatmul.mubr.bf16.vlgmr.msra.gmra.mrb[32].mxu0 %v1848_v38  ;;  %v1837_v43 = vadd.f32 %v4552_v50, %v1814_v1  ;;  %3047 = vmatpush3.bf16.msra.mxu1 %v3356_v29 }
 0x527   : > { %v1813_v2 = vmul.f32 %v4543_v31, %v1790_v62  ;;  %v2998_v52 = vpop.f32.mrb[24].mxu0  ;;  %v1835_v14 = vadd.f32 %v4552_v50, %v1812_v13  ;;  %3048 = vmatprep.subr.bf16.mxu1 %v3357_v3 }
 0x528   : > { %v1838_v56 = vadd.f32 %v4552_v50, %v1815_v51  ;;  %v1763_v30 = vadd.f32 %v2998_v52, %v4537_v10  ;;  %v1754_v41 = vpop.f32.mrb[25].mxu0 }
 0x529   : > { %v1836_v61 = vadd.f32 %v4552_v50, %v1813_v2  ;;  %v1755_v5 = vadd.f32 %v4537_v10, %v1754_v41  ;;  %v2999_v39 = vpop.f32.mrb[26].mxu0 }
 0x52a   : > { %v1795_v59 = vmax.f32 %v1763_v30, 0.0  ;;  %v1766_v9 = vadd.f32 %v2999_v39, %v4537_v10  ;;  %v1757_v42 = vpop.f32.mrb[27].mxu0  ;;  %v1850_v63 = vpack.c.bf16 %v1838_v56, %v1837_v43  ;;  %3049 = vmatpush3.bf16.msra.mxu1 %v3357_v3  ;;  %v4615_v30 = vld [vmem:[%s4897_s3 + $0x1] ss:$0 sm:$0xff] }
 0x52b   : > { %v1793_v0 = vmax.f32 %v1755_v5, 0.0  ;;  %v1758_v20 = vadd.f32 %v4537_v10, %v1757_v42  ;;  %v1849_v6 = vpack.c.bf16 %v1836_v61, %v1835_v14  ;;  %3050 = vmatprep.subr.bf16.mxu1 %v3358_v47 }
 0x52c   : > { %v1818_v18 = vmul.f32 %v4543_v31, %v1795_v59  ;;  %v1796_v60 = vmax.f32 %v1766_v9, 0.0 }
 0x52d   : > { %v1816_v15 = vmul.f32 %v4543_v31, %v1793_v0  ;;  %v1794_v19 = vmax.f32 %v1758_v20, 0.0  ;;  %3024 = vmatprep.mubr.bf16.mxu0 %v1849_v6 }
 0x52e   : > { %v1819_v4 = vmul.f32 %v4543_v31, %v1796_v60  ;;  %3025 = vmatmul.mubr.bf16.gmra.mrb[36].mxu0 %v1850_v63  ;;  %v1841_v40 = vadd.f32 %v4552_v50, %v1818_v18  ;;  %3051 = vmatpush3.bf16.msra.mxu1 %v3358_v47 }
 0x52f   : > { %v1817_v7 = vmul.f32 %v4543_v31, %v1794_v19  ;;  %v3002_v8 = vpop.f32.mrb[28].mxu0  ;;  %v1839_v21 = vadd.f32 %v4552_v50, %v1816_v15 }
 0x530   : > { %v1842_v11 = vadd.f32 %v4552_v50, %v1819_v4  ;;  %v1779_v16 = vadd.f32 %v3002_v8, %v4537_v10  ;;  %v1770_v17 = vpop.f32.mrb[29].mxu0 }
 0x531   : > { %v1840_v55 = vadd.f32 %v4552_v50, %v1817_v7  ;;  %v1771_v44 = vadd.f32 %v4537_v10, %v1770_v17  ;;  %v3003_v22 = vpop.f32.mrb[30].mxu0 }
 0x532   : > { %v1799_v23 = vmax.f32 %v1779_v16, 0.0  ;;  %v1782_v53 = vadd.f32 %v3003_v22, %v4537_v10  ;;  %v1773_v32 = vpop.f32.mrb[31].mxu0  ;;  %v1852_v24 = vpack.c.bf16 %v1842_v11, %v1841_v40 }
 0x533   : > { %v1797_v25 = vmax.f32 %v1771_v44, 0.0  ;;  %v1774_v54 = vadd.f32 %v4537_v10, %v1773_v32  ;;  %v1851_v12 = vpack.c.bf16 %v1840_v55, %v1839_v21 }
 0x534   : > { %v1822_v26 = vmul.f32 %v4543_v31, %v1799_v23  ;;  %v1800_v27 = vmax.f32 %v1782_v53, 0.0 }
 0x535   : > { %v1820_v28 = vmul.f32 %v4543_v31, %v1797_v25  ;;  %v1798_v33 = vmax.f32 %v1774_v54, 0.0  ;;  %3028 = vmatprep.mubr.bf16.mxu0 %v1851_v12 }
 0x536   : > { %v1823_v34 = vmul.f32 %v4543_v31, %v1800_v27  ;;  %3029 = vmatmul.mubr.bf16.gmra.mrb[40].mxu0 %v1852_v24  ;;  %v1845_v57 = vadd.f32 %v4552_v50, %v1822_v26 }
 0x537   : > { %v1821_v35 = vmul.f32 %v4543_v31, %v1798_v33  ;;  %v1843_v45 = vadd.f32 %v4552_v50, %v1820_v28  ;;  %v4600_v31 = vld [vmem:[%s4894_s0 + $0x1] ss:$0 sm:$0xff] }
 0x538   : > { %v1846_v36 = vadd.f32 %v4552_v50, %v1823_v34 }
 0x539   : > { %v1844_v10 = vadd.f32 %v4552_v50, %v1821_v35 }
 0x53a   : > { %v1854_v37 = vpack.c.bf16 %v1846_v36, %v1845_v57 }
 0x53b   : > { %v1853_v38 = vpack.c.bf16 %v1844_v10, %v1843_v45 }
 0x53d   : > { %3032 = vmatprep.mubr.bf16.mxu0 %v1853_v38 }
 0x53e   : > { %3033 = vmatmul.mubr.bf16.gmra.mrb[44].mxu0 %v1854_v37 }
 0x5f9   : > { %v3022_v58 = vpop.f32.mrb[32].mxu0 }
 0x5fa   : > { %v1971_v50 = vadd.f32 %v3022_v58, %v4600_v31  ;;  %v1962_v48 = vpop.f32.mrb[33].mxu0 }
 0x5fb   : > { %v1963_v1 = vadd.f32 %v4600_v31, %v1962_v48  ;;  %v3023_v46 = vpop.f32.mrb[34].mxu0 }
 0x5fc   : > { %v2027_v13 = vmax.f32 %v1971_v50, 0.0  ;;  %v1974_v62 = vadd.f32 %v3023_v46, %v4600_v31  ;;  %v1965_v51 = vpop.f32.mrb[35].mxu0 }
 0x5fd   : > { %v2025_v2 = vmax.f32 %v1963_v1, 0.0  ;;  %v1966_v52 = vadd.f32 %v4600_v31, %v1965_v51 }
 0x5fe   : > { %v2051_v43 = vmul.f32 %v4606_v49, %v2027_v13  ;;  %v2028_v56 = vmax.f32 %v1974_v62, 0.0 }
 0x5ff   : > { %v2049_v41 = vmul.f32 %v4606_v49, %v2025_v2  ;;  %v2026_v14 = vmax.f32 %v1966_v52, 0.0 }
 0x600   : > { %v2052_v61 = vmul.f32 %v4606_v49, %v2028_v56  ;;  %v2075_v59 = vadd.f32 %v4615_v30, %v2051_v43 }
 0x601   : > { %v2050_v5 = vmul.f32 %v4606_v49, %v2026_v14  ;;  %v3026_v39 = vpop.f32.mrb[36].mxu0  ;;  %v2073_v0 = vadd.f32 %v4615_v30, %v2049_v41 }
 0x602   : > { %v2076_v9 = vadd.f32 %v4615_v30, %v2052_v61  ;;  %v1987_v42 = vadd.f32 %v3026_v39, %v4600_v31  ;;  %v1978_v63 = vpop.f32.mrb[37].mxu0 }
 0x603   : > { %v2074_v20 = vadd.f32 %v4615_v30, %v2050_v5  ;;  %v1979_v6 = vadd.f32 %v4600_v31, %v1978_v63  ;;  %v3027_v18 = vpop.f32.mrb[38].mxu0 }
 0x604   : > { %v2090_v60 = vpack.c.bf16 %v2076_v9, %v2075_v59  ;;  %v2031_v15 = vmax.f32 %v1987_v42, 0.0  ;;  %v1990_v19 = vadd.f32 %v3027_v18, %v4600_v31  ;;  %v1981_v4 = vpop.f32.mrb[39].mxu0 }
 0x605   : > { %v2029_v7 = vmax.f32 %v1979_v6, 0.0  ;;  %v1982_v8 = vadd.f32 %v4600_v31, %v1981_v4  ;;  %v2089_v40 = vpack.c.bf16 %v2074_v20, %v2073_v0 }
 0x606   : > { %v2055_v11 = vmul.f32 %v4606_v49, %v2031_v15  ;;  %v2032_v16 = vmax.f32 %v1990_v19, 0.0  ;;  %v2635_v19 = vld [vmem:[%s4898_s28] ss:$0 sm:$0xff] }
 0x607   : > { %v2053_v17 = vmul.f32 %v4606_v49, %v2029_v7  ;;  %v2030_v21 = vmax.f32 %v1982_v8, 0.0  ;;  %3052 = vmatprep.mubr.bf16.mxu1 %v2089_v40 }
 0x608   : > { %v2056_v55 = vmul.f32 %v4606_v49, %v2032_v16  ;;  %3053 = vmatmul.mubr.bf16.vlgmr.msra.gmra.mrb[16].mxu1 %v2090_v60  ;;  %v2079_v23 = vadd.f32 %v4615_v30, %v2055_v11 }
 0x609   : > { %v2054_v44 = vmul.f32 %v4606_v49, %v2030_v21  ;;  %v3030_v22 = vpop.f32.mrb[40].mxu0  ;;  %v2077_v25 = vadd.f32 %v4615_v30, %v2053_v17 }
 0x60a   : > { %v2080_v53 = vadd.f32 %v4615_v30, %v2056_v55  ;;  %v2003_v32 = vadd.f32 %v3030_v22, %v4600_v31  ;;  %v1994_v24 = vpop.f32.mrb[41].mxu0 }
 0x60b   : > { %v2078_v54 = vadd.f32 %v4615_v30, %v2054_v44  ;;  %v1995_v12 = vadd.f32 %v4600_v31, %v1994_v24  ;;  %v3031_v26 = vpop.f32.mrb[42].mxu0 }
 0x60c   : > { %v2035_v27 = vmax.f32 %v2003_v32, 0.0  ;;  %v2006_v28 = vadd.f32 %v3031_v26, %v4600_v31  ;;  %v1997_v33 = vpop.f32.mrb[43].mxu0  ;;  %v2092_v34 = vpack.c.bf16 %v2080_v53, %v2079_v23 }
 0x60d   : > { %v2033_v35 = vmax.f32 %v1995_v12, 0.0  ;;  %v1998_v57 = vadd.f32 %v4600_v31, %v1997_v33  ;;  %v2091_v36 = vpack.c.bf16 %v2078_v54, %v2077_v25 }
 0x60e   : > { %v2059_v45 = vmul.f32 %v4606_v49, %v2035_v27  ;;  %v2036_v10 = vmax.f32 %v2006_v28, 0.0 }
 0x60f   : > { %v2057_v37 = vmul.f32 %v4606_v49, %v2033_v35  ;;  %v2034_v38 = vmax.f32 %v1998_v57, 0.0  ;;  %3056 = vmatprep.mubr.bf16.mxu1 %v2091_v36 }
 0x610   : > { %v2060_v29 = vmul.f32 %v4606_v49, %v2036_v10  ;;  %3057 = vmatmul.mubr.bf16.gmra.mrb[20].mxu1 %v2092_v34  ;;  %v2083_v58 = vadd.f32 %v4615_v30, %v2059_v45 }
 0x611   : > { %v2058_v3 = vmul.f32 %v4606_v49, %v2034_v38  ;;  %v3034_v47 = vpop.f32.mrb[44].mxu0  ;;  %v2081_v46 = vadd.f32 %v4615_v30, %v2057_v37 }
 0x612   : > { %v2084_v50 = vadd.f32 %v4615_v30, %v2060_v29  ;;  %v2019_v48 = vadd.f32 %v3034_v47, %v4600_v31  ;;  %v2010_v1 = vpop.f32.mrb[45].mxu0 }
 0x613   : > { %v2082_v13 = vadd.f32 %v4615_v30, %v2058_v3  ;;  %v2011_v62 = vadd.f32 %v4600_v31, %v2010_v1  ;;  %v3035_v51 = vpop.f32.mrb[46].mxu0 }
 0x614   : > { %v2039_v2 = vmax.f32 %v2019_v48, 0.0  ;;  %v2022_v52 = vadd.f32 %v3035_v51, %v4600_v31  ;;  %v2013_v43 = vpop.f32.mrb[47].mxu0  ;;  %v2094_v56 = vpack.c.bf16 %v2084_v50, %v2083_v58 }
 0x615   : > { %v2037_v41 = vmax.f32 %v2011_v62, 0.0  ;;  %v2014_v14 = vadd.f32 %v4600_v31, %v2013_v43  ;;  %v2093_v61 = vpack.c.bf16 %v2082_v13, %v2081_v46 }
 0x616   : > { %v2063_v5 = vmul.f32 %v4606_v49, %v2039_v2  ;;  %v2040_v39 = vmax.f32 %v2022_v52, 0.0 }
 0x617   : > { %v2061_v59 = vmul.f32 %v4606_v49, %v2037_v41  ;;  %v2038_v9 = vmax.f32 %v2014_v14, 0.0  ;;  %3060 = vmatprep.mubr.bf16.mxu1 %v2093_v61 }
 0x618   : > { %v2064_v42 = vmul.f32 %v4606_v49, %v2040_v39  ;;  %3061 = vmatmul.mubr.bf16.gmra.mrb[24].mxu1 %v2094_v56  ;;  %v2087_v0 = vadd.f32 %v4615_v30, %v2063_v5 }
 0x619   : > { %v2062_v63 = vmul.f32 %v4606_v49, %v2038_v9  ;;  %v2085_v6 = vadd.f32 %v4615_v30, %v2061_v59 }
 0x61a   : > { %v2088_v20 = vadd.f32 %v4615_v30, %v2064_v42 }
 0x61b   : > { %v2086_v31 = vadd.f32 %v4615_v30, %v2062_v63 }
 0x61c   : > { %v2096_v18 = vpack.c.bf16 %v2088_v20, %v2087_v0 }
 0x61d   : > { %v2095_v60 = vpack.c.bf16 %v2086_v31, %v2085_v6 }
 0x61f   : > { %3064 = vmatprep.mubr.bf16.mxu1 %v2095_v60 }
 0x620   : > { %3065 = vmatmul.mubr.bf16.gmra.mrb[28].mxu1 %v2096_v18 }
 0x6db   : > { %v3054_v15 = vpop.f32.mrb[16].mxu1 }
 0x6dc   : > { %v2202_v49 = vpop.f32.mrb[17].mxu1  ;;  %v2211_v7 = vadd.f32 %v3054_v15, %v2635_v19 }
 0x6dd   : > { %v3055_v4 = vpop.f32.mrb[18].mxu1  ;;  %v2203_v11 = vadd.f32 %v2635_v19, %v2202_v49 }
 0x6de   : > { %v2214_v8 = vadd.f32 %v3055_v4, %v2635_v19  ;;  %v2205_v40 = vpop.f32.mrb[19].mxu1 }
 0x6df   : > { %v2206_v16 = vadd.f32 %v2635_v19, %v2205_v40 }
 0x6e0   : > { %v2693_v30 = vpack.c.bf16 %v2214_v8, %v2211_v7 }
 0x6e1   : > { %v2688_v17 = vpack.c.bf16 %v2206_v16, %v2203_v11 }
 0x6e2   : > { %2725 = vst [vmem:[%s4323_s19 + $0x8] sm:$0xff] %v2693_v30  }
 0x6e3   : > { %2689 = vst [vmem:[%s4323_s19] sm:$0xff] %v2688_v17   ;;  %v3058_v21 = vpop.f32.mrb[20].mxu1 }
 0x6e4   : > { %v2218_v55 = vpop.f32.mrb[21].mxu1  ;;  %v2227_v22 = vadd.f32 %v3058_v21, %v2635_v19 }
 0x6e5   : > { %v3059_v44 = vpop.f32.mrb[22].mxu1  ;;  %v2219_v32 = vadd.f32 %v2635_v19, %v2218_v55 }
 0x6e6   : > { %v2230_v23 = vadd.f32 %v3059_v44, %v2635_v19  ;;  %v2221_v53 = vpop.f32.mrb[23].mxu1 }
 0x6e7   : > { %v2222_v24 = vadd.f32 %v2635_v19, %v2221_v53 }
 0x6e8   : > { %v2703_v25 = vpack.c.bf16 %v2230_v23, %v2227_v22 }
 0x6e9   : > { %v2698_v54 = vpack.c.bf16 %v2222_v24, %v2219_v32 }
 0x6ea   : > { %2727 = vst [vmem:[%s4323_s19 + $0x18] sm:$0xff] %v2703_v25  }
 0x6eb   : > { %2726 = vst [vmem:[%s4323_s19 + $0x10] sm:$0xff] %v2698_v54   ;;  %v3062_v12 = vpop.f32.mrb[24].mxu1 }
 0x6ec   : > { %v2234_v26 = vpop.f32.mrb[25].mxu1  ;;  %v2243_v28 = vadd.f32 %v3062_v12, %v2635_v19 }
 0x6ed   : > { %v3063_v27 = vpop.f32.mrb[26].mxu1  ;;  %v2235_v35 = vadd.f32 %v2635_v19, %v2234_v26 }
 0x6ee   : > { %v2246_v33 = vadd.f32 %v3063_v27, %v2635_v19  ;;  %v2237_v34 = vpop.f32.mrb[27].mxu1 }
 0x6ef   : > { %v2238_v57 = vadd.f32 %v2635_v19, %v2237_v34 }
 0x6f0   : > { %v2713_v36 = vpack.c.bf16 %v2246_v33, %v2243_v28 }
 0x6f1   : > { %v2708_v45 = vpack.c.bf16 %v2238_v57, %v2235_v35 }
 0x6f2   : > { %2729 = vst [vmem:[%s4323_s19 + $0x28] sm:$0xff] %v2713_v36  }
 0x6f3   : > { %2728 = vst [vmem:[%s4323_s19 + $0x20] sm:$0xff] %v2708_v45   ;;  %v3066_v10 = vpop.f32.mrb[28].mxu1 }
 0x6f4   : > { %v2250_v37 = vpop.f32.mrb[29].mxu1  ;;  %v2259_v29 = vadd.f32 %v3066_v10, %v2635_v19 }
 0x6f5   : > { %v3067_v38 = vpop.f32.mrb[30].mxu1  ;;  %v2251_v58 = vadd.f32 %v2635_v19, %v2250_v37 }
 0x6f6   : > { %v2262_v3 = vadd.f32 %v3067_v38, %v2635_v19  ;;  %v2253_v47 = vpop.f32.mrb[31].mxu1 }
 0x6f7   : > { %v2254_v50 = vadd.f32 %v2635_v19, %v2253_v47 }
 0x6f8   : > { %v2723_v48 = vpack.c.bf16 %v2262_v3, %v2259_v29 }
 0x6f9   : > { %v2718_v1 = vpack.c.bf16 %v2254_v50, %v2251_v58 }
 0x6fa   : > { %2731 = vst [vmem:[%s4323_s19 + $0x38] sm:$0xff] %v2723_v48  }
 0x6fb   : > { %2730 = vst [vmem:[%s4323_s19 + $0x30] sm:$0xff] %v2718_v1  }
 0x6fc PF: > { %s4899_s22 = sld [smem:[#allocation31_spill]]  ;;  %s4901_s14 = sld [smem:[#allocation35_spill]] }
 0x6fd   : > { %s4902_s27 = sld [smem:[#allocation55_spill]]  ;;  %s2359_s21 = sshll.u32 %s4323_s19, 4  ;;  %s4678_s21 = int_to_ptr.vmem [resolvable:$true] %s2359_s21 }
 0x6fe   : > { %s4682_s17 = scalar_lea.sflag [#allocation5], %s591_s10  ;;  %s3589_s13 = scalar_lea.vmem %s4678_s21, 1024 }
 0x6ff   : > { %p3590_p6 = scmp.ne.s32.totalorder %s4678_s21, %s3589_s13  ;;  %s3771_s12 = smov [#allocation17]  }
 0x700   : > { %s3593_s11 = sshll.u32 %s3771_s12, 4  ;;  %s3594_s11 = int_to_ptr.vmem [resolvable:$false] %s3593_s11 }
 0x701   : > { %s3595_s20 = scalar_lea.vmem %s3594_s11, 2048  ;;  %p3596_p8 = scmp.lt.s32.totalorder %s4678_s21, %s3594_s11 }
 0x702   : > { %s2684_s30 = sshll.u32 %s4899_s22, 10  ;;  %p4904_p7 = scmp.ne.s32.totalorder %s4901_s14, 0 }
 0x703   : > { %s4903_s9 = smov %s4902_s27  ;;  %s4675_s24 = scalar_lea.hbm %s4902_s27, %s2684_s30 }
 0x704   : > { %p3591_p12 = pnand %p3590_p6, %p4904_p7  ;;  %p3597_p4 = scmp.lt.s32.totalorder %s3595_s20, %s3589_s13 }
 0x706   : > { %p3592_p13 = pneg %p3591_p12  ;;  %p3598_p11 = por %p3597_p4, %p3596_p8 }
 0x708   : > { %p3599_p0 = pnand %p3598_p11, %p3592_p13 }
 0x70a   : > { %3602 = shalt.err (!%p3599_p0)
}
 0x70b   : > { %s3603_s10 = scalar_lea.hbm %s4675_s24, 1024  ;;  %s3607_s8 = scalar_lea.hbm %s4903_s9, 2048 }
 0x70c   : > { %p3604_p2 = scmp.ne.s32.totalorder %s4675_s24, %s3603_s10  ;;  %p3608_p10 = scmp.lt.u32.totalorder %s4675_s24, %s4903_s9 }
 0x70d   : > { %p3609_p5 = scmp.lt.u32.totalorder %s3607_s8, %s3603_s10  ;;  %p3611_p6 = scmp.lt.u32.totalorder %s3603_s10, %s4675_s24 }
 0x70e   : > { %p3605_p9 = pnand %p3604_p2, %p4904_p7 }
 0x70f   : > { %p3610_p1 = por %p3609_p5, %p3608_p10 }
 0x710   : > { %p3606_p3 = pneg %p3605_p9 }
 0x711   : > { %p3612_p12 = por %p3611_p6, %p3610_p1 }
 0x713   : > { %p3613_p13 = pnand %p3612_p12, %p3606_p3 }
 0x715   : > { %3616 = shalt.err (!%p3613_p13)
}
 0x716   : > { %s3772_s4 = smov 64   ;;  %s3773_s30 = smov 4  }
 0x717   : > { %3126 = dma.vmem_to_hbm [thread:$0]  (%p4904_p7), %s4678_s21, 1024, %s4675_s24, %s4682_s17, %s3772_s4, %s3772_s4, %s3773_s30  }
 0x718 PF: > { %s4905_s18 = sld [smem:[#allocation28_spill]]  ;;  %s4906_s6 = sld [smem:[#allocation36_spill]] }
 0x719   : > { %p3169_p8 = scmp.ge.s32.totalorder %s3755_s16, 2 }
 0x71e   : > { %s2374_s27 = sand.u32 1, %s4905_s18   ;;  %p4907_p4 = scmp.ne.s32.totalorder %s4906_s6, 0 }
 0x71f   : > { %s2375_s13 = scalar_lea.sflag [#allocation5], %s2374_s27 }
 0x720   : > { %p3155_p11 = pnand %p3169_p8, %p4907_p4 }
 0x722   : > { %3698 = dma.done.wait (!%p3155_p11), %s2375_s13, 1024  }
 0x723   : > { %3700 = vsyncadd (!%p3155_p11), %s2375_s13, 4294966272  ;;  %s37_s16 = sadd.s32 1, %s3755_s16   ;;  %s4909_s18 = sld [smem:[#allocation26_spill]] }
 0x724   : > { %p4711_p0 = scmp.ge.s32.totalorder %s37_s16, 6   ;;  %s4910_s19 = sld [smem:[#allocation27_spill]] }
 0x725   : > { %s4911_s21 = sld [smem:[#allocation29_spill]]  ;;  %s4912_s14 = sld [smem:[#allocation39_spill]] }
 0x726   : > { %s4913_s28 = sld [smem:[#allocation32_spill]]  ;;  %s4914_s17 = sld [smem:[#allocation37_spill]] }
 0x727   : > { %s4915_s30 = sld [smem:[#allocation38_spill]]  ;;  %s4916_s20 = smov %s4229_s5 }
 0x728   : > { %s4917_s22 = smov %s3723_s23  ;;  %s4918_s23 = smov %s4174_s7 }
 0x729   : > { %s4919_s24 = smov %s3731_s25  ;;  %s4920_s25 = smov %s3735_s26 }
 0x72a   : > { %s4922_s27 = smov %s3747_s29  ;;  %36 = sbr.rel (!%p4711_p0) target bundleno = 32 (0x20), region = 181 }
 0x72b   : > { %s4921_s26 = smov %s4912_s14 }
 0x72c   : > { %s4923_s29 = smov %s4914_s17 }
 0x731   :  { %2380 = vsyncpa [#allocation4], 1 }
 0x732   :  { %2382 = vsyncpa [#allocation4 + $0x1], 1 }
 0x733   :  { %2383 = vsyncpa [#allocation7], 1 }
 0x734   :  { %2385 = vsyncpa [#allocation7 + $0x1], 1 }
 0x735   :  { %2386 = vsyncpa [#allocation10], 1 }
 0x736   :  { %2387 = vsyncpa [#allocation13], 1 }
 0x737   :  { %2388 = vsyncpa [#allocation16], 1 }
 0x738   :  { %2389 = vsyncpa [#allocation5], 1 }
 0x739   :  { %2391 = vsyncpa [#allocation5 + $0x1], 1 }

</bundles_post_ra>
